<compile_context>
chip_gen: v7x
topology: tpu7x:2x2x1
jax: 0.10.0
libtpu: 0.0.40
codegen_flags: <defaults>
</compile_context>

<pallas_src>
import functools

import jax
import jax.numpy as jnp
from jax import lax
from jax.experimental import pallas as pl
from jax.experimental.pallas import tpu as pltpu


# ----------------------------------------------------------------------------
# Fused kernel: bottleneck + zero-pad + 3x3 conv (im2col) + channel concat.
# ----------------------------------------------------------------------------
def fused_layer_kernel(x_ref, s1_ref, b1_ref, w1_ref, s2_ref, b2_ref, w2_ref,
                       o_ref, a_scr, cols_scr, *, TH, H, W, Cin, C4, K,
                       num_bands):
    j = pl.program_id(1)                         # band index
    row0 = j * TH
    if TH % 8 == 0:
        row0 = pl.multiple_of(row0, TH)

    # ---- gather TH+2 halo rows from the resident full-image block ----
    # Border halo reads are clamped; their bottleneck values are discarded
    # (zeroed below) so clamping only avoids OOB, it never changes results.
    top_idx = jnp.maximum(row0 - 1, 0)
    bot_idx = jnp.minimum(row0 + TH, H - 1)
    top = x_ref[0, pl.ds(top_idx, 1)]            # (1,  W, Cin)
    center = x_ref[0, pl.ds(row0, TH)]           # (TH, W, Cin)
    bot = x_ref[0, pl.ds(bot_idx, 1)]            # (1,  W, Cin)
    xb = jnp.concatenate([top, center, bot], axis=0)     # (TH+2, W, Cin)

    # ---- bottleneck on TH+2 rows: BN1 + ReLU + 1x1 conv + BN2 + ReLU ----
    hb = jnp.maximum(xb * s1_ref[...] + b1_ref[...], 0.0)           # BN1 + ReLU
    h = jnp.dot(hb.reshape((TH + 2) * W, Cin), w1_ref[...],
                preferred_element_type=jnp.float32)                 # 1x1 conv (MXU)
    a_band = jnp.maximum(h * s2_ref[...] + b2_ref[...], 0.0)        # BN2 + ReLU

    # ---- zero-padded activation tile (zeros == Conv2d padding=1 input) ----
    # Only the interior is (re)written; just the two pad columns and (at the
    # image borders) the halo rows are zeroed -- no full-tile memset.
    a_scr[:, 1:W + 1, :] = a_band.reshape(TH + 2, W, C4)
    zcol = jnp.zeros((TH + 2, 1, C4), jnp.float32)
    a_scr[:, 0:1, :] = zcol
    a_scr[:, W + 1:W + 2, :] = zcol

    @pl.when(j == 0)
    def _():
        a_scr[0, :, :] = jnp.zeros((W + 2, C4), jnp.float32)

    @pl.when(j == num_bands - 1)
    def _():
        a_scr[TH + 1, :, :] = jnp.zeros((W + 2, C4), jnp.float32)

    # ---- 3x3 conv: im2col staging + ONE wide-contraction MXU matmul ----
    for dy in range(3):
        for dx in range(3):
            t = dy * 3 + dx
            cols_scr[:, :, t * C4:(t + 1) * C4] = a_scr[dy:dy + TH, dx:dx + W, :]
    conv = jnp.dot(cols_scr[...].reshape(TH * W, 9 * C4), w2_ref[...],
                   preferred_element_type=jnp.float32)              # (TH*W, K)

    # ---- fused concat: write x and conv channels into the output tile ----
    o_ref[0, :, :, 0:Cin] = center.astype(o_ref.dtype)
    o_ref[0, :, :, Cin:Cin + K] = conv.reshape(TH, W, K).astype(o_ref.dtype)


def _fold_bn(gamma, beta, mean, var, eps=1e-5):
    scale = gamma / jnp.sqrt(var + eps)
    shift = beta - mean * scale
    return scale, shift


def _pick_band_rows(H, target):
    """Largest divisor of H that is <= target (>= 1)."""
    th = max(min(target, H), 1)
    while H % th:
        th -= 1
    return th


def dense_layer_forward(x_nchw, params, band_rows=None):
    """Pallas implementation of layer.forward. Input/output are NCHW."""
    (g1, b1, m1, v1, w1, g2, b2, m2, v2, w2) = params
    N, Cin, H, W = x_nchw.shape
    C4 = w1.shape[0]          # 4*k   (w1: (4k, Cin, 1, 1) torch layout)
    K = w2.shape[0]           # k     (w2: (k, 4k, 3, 3)   torch layout)
    if band_rows is None:
        band_rows = max(H // 2, 1)       # ~2 bands: low halo recompute, >=2 grid steps
    TH = _pick_band_rows(H, band_rows)
    num_bands = H // TH

    # TODO(synk): keep the surrounding model NHWC end-to-end so these
    # full-tensor transposes (pure HBM traffic for a memory-bound layer) vanish.
    x_nhwc = jnp.transpose(x_nchw, (0, 2, 3, 1)).astype(jnp.float32)   # (N,H,W,Cin)

    # Fold BN params (inference semantics).
    s1, sh1 = _fold_bn(g1, b1, m1, v1)
    s2, sh2 = _fold_bn(g2, b2, m2, v2)

    w1_mat = jnp.transpose(w1[:, :, 0, 0], (1, 0))                    # (Cin, 4k)
    w2_mat = jnp.transpose(w2, (2, 3, 1, 0)).reshape(9 * C4, K)       # (9*4k, k)

    kernel = functools.partial(fused_layer_kernel, TH=TH, H=H, W=W, Cin=Cin,
                               C4=C4, K=K, num_bands=num_bands)

    out_nhwc = pl.pallas_call(
        kernel,
        out_shape=jax.ShapeDtypeStruct((N, H, W, Cin + K), jnp.float32),
        grid_spec=pltpu.PrefetchScalarGridSpec(
            num_scalar_prefetch=0,
            grid=(N, num_bands),
            in_specs=[
                # Full image resident per n; block index constant in j, so the
                # image is DMA'd once per n (no per-band re-fetch, no halo dup).
                pl.BlockSpec((1, H, W, Cin), lambda n, j: (n, 0, 0, 0)),
                pl.BlockSpec((1, Cin), lambda n, j: (0, 0)),
                pl.BlockSpec((1, Cin), lambda n, j: (0, 0)),
                pl.BlockSpec((Cin, C4), lambda n, j: (0, 0)),
                pl.BlockSpec((1, C4), lambda n, j: (0, 0)),
                pl.BlockSpec((1, C4), lambda n, j: (0, 0)),
                pl.BlockSpec((9 * C4, K), lambda n, j: (0, 0)),
            ],
            out_specs=pl.BlockSpec((1, TH, W, Cin + K), lambda n, j: (n, j, 0, 0)),
            scratch_shapes=[
                pltpu.VMEM((TH + 2, W + 2, C4), jnp.float32),   # padded activations
                pltpu.VMEM((TH, W, 9 * C4), jnp.float32),       # im2col staging
            ],
        ),
        compiler_params=pltpu.CompilerParams(
            dimension_semantics=("parallel", "parallel"),
            vmem_limit_bytes=32 * 1024 * 1024,
        ),
    )(x_nhwc, s1.reshape(1, Cin), sh1.reshape(1, Cin), w1_mat,
      s2.reshape(1, C4), sh2.reshape(1, C4), w2_mat)

    return jnp.transpose(out_nhwc, (0, 3, 1, 2))


# ----------------------------------------------------------------------------
# Pure-JAX reference (same inference-mode BN semantics) for verification.
# ----------------------------------------------------------------------------
def reference_forward(x, params):
    (g1, b1, m1, v1, w1, g2, b2, m2, v2, w2) = params
    eps = 1e-5

    def bn(x, g, b, m, v):
        return (x - m[None, :, None, None]) / jnp.sqrt(v[None, :, None, None] + eps) \
               * g[None, :, None, None] + b[None, :, None, None]

    h = jnp.maximum(bn(x, g1, b1, m1, v1), 0.0)
    h = lax.conv_general_dilated(h, w1, (1, 1), "VALID",
                                 dimension_numbers=("NCHW", "OIHW", "NCHW"))
    h = jnp.maximum(bn(h, g2, b2, m2, v2), 0.0)
    h = lax.conv_general_dilated(h, w2, (1, 1), ((1, 1), (1, 1)),
                                 dimension_numbers=("NCHW", "OIHW", "NCHW"))
    return jnp.concatenate([x, h], axis=1)


def make_params(key, in_channels, k):
    keys = jax.random.split(key, 10)
    C4 = 4 * k
    g1 = jax.random.uniform(keys[0], (in_channels,), minval=0.5, maxval=1.5)
    b1 = 0.1 * jax.random.normal(keys[1], (in_channels,))
    m1 = 0.1 * jax.random.normal(keys[2], (in_channels,))
    v1 = jax.random.uniform(keys[3], (in_channels,), minval=0.5, maxval=1.5)
    w1 = jax.random.normal(keys[4], (C4, in_channels, 1, 1)) * (1.0 / jnp.sqrt(in_channels))
    g2 = jax.random.uniform(keys[5], (C4,), minval=0.5, maxval=1.5)
    b2 = 0.1 * jax.random.normal(keys[6], (C4,))
    m2 = 0.1 * jax.random.normal(keys[7], (C4,))
    v2 = jax.random.uniform(keys[8], (C4,), minval=0.5, maxval=1.5)
    w2 = jax.random.normal(keys[9], (k, C4, 3, 3)) * (1.0 / jnp.sqrt(9 * C4))
    return tuple(jnp.asarray(p, jnp.float32) for p in (g1, b1, m1, v1, w1,
                                                       g2, b2, m2, v2, w2))


if __name__ == "__main__":
    in_channels, k = 4, 4
    N, H, W = 2, 16, 16

    key = jax.random.PRNGKey(0)
    kx, kp = jax.random.split(key)
    x = jax.random.normal(kx, (N, in_channels, H, W), dtype=jnp.float32)
    params = make_params(kp, in_channels, k)

    out = jax.block_until_ready(dense_layer_forward(x, params))
    ref = jax.block_until_ready(reference_forward(x, params))

    assert out.shape == (N, in_channels + k, H, W), out.shape
    err = float(jnp.max(jnp.abs(out - ref)))
    assert jnp.allclose(out, ref, atol=2e-4, rtol=2e-4), err
    print("KERNEL_OK")
</pallas_src>

<mosaic_0001>
module attributes {stable_mosaic.version = 11 : i64} {
  func.func @fused_layer_kernel(%arg0: i32, %arg1: i32, %arg2: memref<1x16x16x4xf32, #tpu.memory_space<vmem>>, %arg3: memref<1x4xf32, #tpu.memory_space<vmem>>, %arg4: memref<1x4xf32, #tpu.memory_space<vmem>>, %arg5: memref<4x16xf32, #tpu.memory_space<vmem>>, %arg6: memref<1x16xf32, #tpu.memory_space<vmem>>, %arg7: memref<1x16xf32, #tpu.memory_space<vmem>>, %arg8: memref<144x4xf32, #tpu.memory_space<vmem>>, %arg9: memref<1x8x16x8xf32, #tpu.memory_space<vmem>>, %arg10: memref<10x18x16xf32, #tpu.memory_space<vmem>>, %arg11: memref<8x16x144xf32, #tpu.memory_space<vmem>>) attributes {dimension_semantics = [#tpu.dimension_semantics<parallel>, #tpu.dimension_semantics<parallel>], iteration_bounds = array<i64: 2, 2>, scalar_prefetch = 0 : i64, scratch_operands = 2 : i64, tpu.core_type = #tpu.core_type<tc>, window_params = [{transform_indices = @transform_0, window_bounds = array<i64: 1, 16, 16, 4>}, {pipeline_mode = #tpu.pipeline_mode<synchronous>, transform_indices = @transform_1, window_bounds = array<i64: 1, 4>}, {pipeline_mode = #tpu.pipeline_mode<synchronous>, transform_indices = @transform_2, window_bounds = array<i64: 1, 4>}, {pipeline_mode = #tpu.pipeline_mode<synchronous>, transform_indices = @transform_3, window_bounds = array<i64: 4, 16>}, {pipeline_mode = #tpu.pipeline_mode<synchronous>, transform_indices = @transform_4, window_bounds = array<i64: 1, 16>}, {pipeline_mode = #tpu.pipeline_mode<synchronous>, transform_indices = @transform_5, window_bounds = array<i64: 1, 16>}, {pipeline_mode = #tpu.pipeline_mode<synchronous>, transform_indices = @transform_6, window_bounds = array<i64: 144, 4>}, {transform_indices = @transform_7, window_bounds = array<i64: 1, 8, 16, 8>}]} {
    %c8_i32 = arith.constant 8 : i32
    %0 = arith.muli %arg1, %c8_i32 : i32
    %1 = tpu.assume_multiple %0, 8 : i32
    %c1_i32 = arith.constant 1 : i32
    %2 = arith.subi %1, %c1_i32 : i32
    %c0_i32 = arith.constant 0 : i32
    %3 = arith.maxsi %2, %c0_i32 : i32
    %c8_i32_0 = arith.constant 8 : i32
    %4 = arith.addi %1, %c8_i32_0 : i32
    %c15_i32 = arith.constant 15 : i32
    %5 = arith.minsi %4, %c15_i32 : i32
    %c0 = arith.constant 0 : index
    %6 = arith.index_cast %3 : i32 to index
    %c0_1 = arith.constant 0 : index
    %c0_2 = arith.constant 0 : index
    %7 = vector.load %arg2[%c0, %6, %c0_1, %c0_2] : memref<1x16x16x4xf32, #tpu.memory_space<vmem>>, vector<1x1x16x4xf32>
    %8 = vector.shape_cast %7 : vector<1x1x16x4xf32> to vector<1x16x4xf32>
    %c0_3 = arith.constant 0 : index
    %9 = arith.index_cast %1 : i32 to index
    %c0_4 = arith.constant 0 : index
    %c0_5 = arith.constant 0 : index
    %10 = vector.load %arg2[%c0_3, %9, %c0_4, %c0_5] : memref<1x16x16x4xf32, #tpu.memory_space<vmem>>, vector<1x8x16x4xf32>
    %11 = vector.shape_cast %10 : vector<1x8x16x4xf32> to vector<8x16x4xf32>
    %c0_6 = arith.constant 0 : index
    %12 = arith.index_cast %5 : i32 to index
    %c0_7 = arith.constant 0 : index
    %c0_8 = arith.constant 0 : index
    %13 = vector.load %arg2[%c0_6, %12, %c0_7, %c0_8] : memref<1x16x16x4xf32, #tpu.memory_space<vmem>>, vector<1x1x16x4xf32>
    %14 = vector.shape_cast %13 : vector<1x1x16x4xf32> to vector<1x16x4xf32>
    %15 = tpu.concatenate %8, %11, %14 in 0 : vector<1x16x4xf32>, vector<8x16x4xf32>, vector<1x16x4xf32> -> vector<10x16x4xf32>
    %c0_9 = arith.constant 0 : index
    %c0_10 = arith.constant 0 : index
    %16 = vector.load %arg3[%c0_9, %c0_10] : memref<1x4xf32, #tpu.memory_space<vmem>>, vector<1x4xf32>
    %17 = vector.shape_cast %16 : vector<1x4xf32> to vector<1x1x4xf32>
    %18 = vector.broadcast %17 : vector<1x1x4xf32> to vector<10x16x4xf32>
    %19 = arith.mulf %15, %18 : vector<10x16x4xf32>
    %c0_11 = arith.constant 0 : index
    %c0_12 = arith.constant 0 : index
    %20 = vector.load %arg4[%c0_11, %c0_12] : memref<1x4xf32, #tpu.memory_space<vmem>>, vector<1x4xf32>
    %21 = vector.shape_cast %20 : vector<1x4xf32> to vector<1x1x4xf32>
    %22 = vector.broadcast %21 : vector<1x1x4xf32> to vector<10x16x4xf32>
    %23 = arith.addf %19, %22 : vector<10x16x4xf32>
    %cst = arith.constant 0.000000e+00 : f32
    %24 = vector.broadcast %cst : f32 to vector<10x16x4xf32>
    %25 = arith.maximumf %23, %24 : vector<10x16x4xf32>
    %26 = vector.shape_cast %25 : vector<10x16x4xf32> to vector<160x4xf32>
    %c0_13 = arith.constant 0 : index
    %c0_14 = arith.constant 0 : index
    %27 = vector.load %arg5[%c0_13, %c0_14] : memref<4x16xf32, #tpu.memory_space<vmem>>, vector<4x16xf32>
    %cst_15 = arith.constant dense<0.000000e+00> : vector<160x16xf32>
    %28 = tpu.matmul %26, %27, %cst_15 {dimension_numbers = #tpu.dot_dimension_numbers<[1], [0], [0], [1], [0, 0, 1, 1], [], []>} : vector<160x4xf32>, vector<4x16xf32>, vector<160x16xf32> -> vector<160x16xf32>
    %c0_16 = arith.constant 0 : index
    %c0_17 = arith.constant 0 : index
    %29 = vector.load %arg6[%c0_16, %c0_17] : memref<1x16xf32, #tpu.memory_space<vmem>>, vector<1x16xf32>
    %30 = vector.broadcast %29 : vector<1x16xf32> to vector<160x16xf32>
    %31 = arith.mulf %28, %30 : vector<160x16xf32>
    %c0_18 = arith.constant 0 : index
    %c0_19 = arith.constant 0 : index
    %32 = vector.load %arg7[%c0_18, %c0_19] : memref<1x16xf32, #tpu.memory_space<vmem>>, vector<1x16xf32>
    %33 = vector.broadcast %32 : vector<1x16xf32> to vector<160x16xf32>
    %34 = arith.addf %31, %33 : vector<160x16xf32>
    %cst_20 = arith.constant 0.000000e+00 : f32
    %35 = vector.broadcast %cst_20 : f32 to vector<160x16xf32>
    %36 = arith.maximumf %34, %35 : vector<160x16xf32>
    %37 = vector.shape_cast %36 : vector<160x16xf32> to vector<10x16x16xf32>
    %c0_21 = arith.constant 0 : index
    %c1 = arith.constant 1 : index
    %c0_22 = arith.constant 0 : index
    %38 = vector.load %arg10[%c0_21, %c1, %c0_22] : memref<10x18x16xf32, #tpu.memory_space<vmem>>, vector<10x16x16xf32>
    tpu.vector_store %arg10[%c0_21, %c1, %c0_22], %37 {strides = array<i32>} : memref<10x18x16xf32, #tpu.memory_space<vmem>>, vector<10x16x16xf32>,
    %cst_23 = arith.constant 0.000000e+00 : f32
    %39 = vector.broadcast %cst_23 : f32 to vector<10x1x16xf32>
    %c0_24 = arith.constant 0 : index
    %c0_25 = arith.constant 0 : index
    %c0_26 = arith.constant 0 : index
    %40 = vector.load %arg10[%c0_24, %c0_25, %c0_26] : memref<10x18x16xf32, #tpu.memory_space<vmem>>, vector<10x1x16xf32>
    tpu.vector_store %arg10[%c0_24, %c0_25, %c0_26], %39 {strides = array<i32>} : memref<10x18x16xf32, #tpu.memory_space<vmem>>, vector<10x1x16xf32>,
    %c0_27 = arith.constant 0 : index
    %c17 = arith.constant 17 : index
    %c0_28 = arith.constant 0 : index
    %41 = vector.load %arg10[%c0_27, %c17, %c0_28] : memref<10x18x16xf32, #tpu.memory_space<vmem>>, vector<10x1x16xf32>
    tpu.vector_store %arg10[%c0_27, %c17, %c0_28], %39 {strides = array<i32>} : memref<10x18x16xf32, #tpu.memory_space<vmem>>, vector<10x1x16xf32>,
    %c0_i32_29 = arith.constant 0 : i32
    %42 = arith.cmpi eq, %arg1, %c0_i32_29 : i32
    %43 = arith.extui %42 : i1 to i32
    %c0_i32_30 = arith.constant 0 : i32
    %44 = arith.cmpi ne, %43, %c0_i32_30 : i32
    scf.if %44 {
      %cst_91 = arith.constant 0.000000e+00 : f32
      %77 = vector.broadcast %cst_91 : f32 to vector<18x16xf32>
      %c0_92 = arith.constant 0 : index
      %c0_93 = arith.constant 0 : index
      %c0_94 = arith.constant 0 : index
      %78 = vector.load %arg10[%c0_92, %c0_93, %c0_94] : memref<10x18x16xf32, #tpu.memory_space<vmem>>, vector<1x18x16xf32>
      %79 = vector.shape_cast %78 : vector<1x18x16xf32> to vector<18x16xf32>
      %80 = vector.shape_cast %77 : vector<18x16xf32> to vector<1x18x16xf32>
      tpu.vector_store %arg10[%c0_92, %c0_93, %c0_94], %80 {strides = array<i32>} : memref<10x18x16xf32, #tpu.memory_space<vmem>>, vector<1x18x16xf32>,
    } else {
    }
    %c1_i32_31 = arith.constant 1 : i32
    %45 = arith.cmpi eq, %arg1, %c1_i32_31 : i32
    %46 = arith.extui %45 : i1 to i32
    %c0_i32_32 = arith.constant 0 : i32
    %47 = arith.cmpi ne, %46, %c0_i32_32 : i32
    scf.if %47 {
      %cst_91 = arith.constant 0.000000e+00 : f32
      %77 = vector.broadcast %cst_91 : f32 to vector<18x16xf32>
      %c9 = arith.constant 9 : index
      %c0_92 = arith.constant 0 : index
      %c0_93 = arith.constant 0 : index
      %78 = vector.load %arg10[%c9, %c0_92, %c0_93] : memref<10x18x16xf32, #tpu.memory_space<vmem>>, vector<1x18x16xf32>
      %79 = vector.shape_cast %78 : vector<1x18x16xf32> to vector<18x16xf32>
      %80 = vector.shape_cast %77 : vector<18x16xf32> to vector<1x18x16xf32>
      tpu.vector_store %arg10[%c9, %c0_92, %c0_93], %80 {strides = array<i32>} : memref<10x18x16xf32, #tpu.memory_space<vmem>>, vector<1x18x16xf32>,
    } else {
    }
    %c0_33 = arith.constant 0 : index
    %c0_34 = arith.constant 0 : index
    %c0_35 = arith.constant 0 : index
    %48 = vector.load %arg10[%c0_33, %c0_34, %c0_35] : memref<10x18x16xf32, #tpu.memory_space<vmem>>, vector<8x16x16xf32>
    %c0_36 = arith.constant 0 : index
    %c0_37 = arith.constant 0 : index
    %c0_38 = arith.constant 0 : index
    %49 = vector.load %arg11[%c0_36, %c0_37, %c0_38] : memref<8x16x144xf32, #tpu.memory_space<vmem>>, vector<8x16x16xf32>
    tpu.vector_store %arg11[%c0_36, %c0_37, %c0_38], %48 {strides = array<i32>} : memref<8x16x144xf32, #tpu.memory_space<vmem>>, vector<8x16x16xf32>,
    %c0_39 = arith.constant 0 : index
    %c1_40 = arith.constant 1 : index
    %c0_41 = arith.constant 0 : index
    %50 = vector.load %arg10[%c0_39, %c1_40, %c0_41] : memref<10x18x16xf32, #tpu.memory_space<vmem>>, vector<8x16x16xf32>
    %c0_42 = arith.constant 0 : index
    %c0_43 = arith.constant 0 : index
    %c16 = arith.constant 16 : index
    %51 = vector.load %arg11[%c0_42, %c0_43, %c16] : memref<8x16x144xf32, #tpu.memory_space<vmem>>, vector<8x16x16xf32>
    tpu.vector_store %arg11[%c0_42, %c0_43, %c16], %50 {strides = array<i32>} : memref<8x16x144xf32, #tpu.memory_space<vmem>>, vector<8x16x16xf32>,
    %c0_44 = arith.constant 0 : index
    %c2 = arith.constant 2 : index
    %c0_45 = arith.constant 0 : index
    %52 = vector.load %arg10[%c0_44, %c2, %c0_45] : memref<10x18x16xf32, #tpu.memory_space<vmem>>, vector<8x16x16xf32>
    %c0_46 = arith.constant 0 : index
    %c0_47 = arith.constant 0 : index
    %c32 = arith.constant 32 : index
    %53 = vector.load %arg11[%c0_46, %c0_47, %c32] : memref<8x16x144xf32, #tpu.memory_space<vmem>>, vector<8x16x16xf32>
    tpu.vector_store %arg11[%c0_46, %c0_47, %c32], %52 {strides = array<i32>} : memref<8x16x144xf32, #tpu.memory_space<vmem>>, vector<8x16x16xf32>,
    %c1_48 = arith.constant 1 : index
    %c0_49 = arith.constant 0 : index
    %c0_50 = arith.constant 0 : index
    %54 = vector.load %arg10[%c1_48, %c0_49, %c0_50] : memref<10x18x16xf32, #tpu.memory_space<vmem>>, vector<8x16x16xf32>
    %c0_51 = arith.constant 0 : index
    %c0_52 = arith.constant 0 : index
    %c48 = arith.constant 48 : index
    %55 = vector.load %arg11[%c0_51, %c0_52, %c48] : memref<8x16x144xf32, #tpu.memory_space<vmem>>, vector<8x16x16xf32>
    tpu.vector_store %arg11[%c0_51, %c0_52, %c48], %54 {strides = array<i32>} : memref<8x16x144xf32, #tpu.memory_space<vmem>>, vector<8x16x16xf32>,
    %c1_53 = arith.constant 1 : index
    %c1_54 = arith.constant 1 : index
    %c0_55 = arith.constant 0 : index
    %56 = vector.load %arg10[%c1_53, %c1_54, %c0_55] : memref<10x18x16xf32, #tpu.memory_space<vmem>>, vector<8x16x16xf32>
    %c0_56 = arith.constant 0 : index
    %c0_57 = arith.constant 0 : index
    %c64 = arith.constant 64 : index
    %57 = vector.load %arg11[%c0_56, %c0_57, %c64] : memref<8x16x144xf32, #tpu.memory_space<vmem>>, vector<8x16x16xf32>
    tpu.vector_store %arg11[%c0_56, %c0_57, %c64], %56 {strides = array<i32>} : memref<8x16x144xf32, #tpu.memory_space<vmem>>, vector<8x16x16xf32>,
    %c1_58 = arith.constant 1 : index
    %c2_59 = arith.constant 2 : index
    %c0_60 = arith.constant 0 : index
    %58 = vector.load %arg10[%c1_58, %c2_59, %c0_60] : memref<10x18x16xf32, #tpu.memory_space<vmem>>, vector<8x16x16xf32>
    %c0_61 = arith.constant 0 : index
    %c0_62 = arith.constant 0 : index
    %c80 = arith.constant 80 : index
    %59 = vector.load %arg11[%c0_61, %c0_62, %c80] : memref<8x16x144xf32, #tpu.memory_space<vmem>>, vector<8x16x16xf32>
    tpu.vector_store %arg11[%c0_61, %c0_62, %c80], %58 {strides = array<i32>} : memref<8x16x144xf32, #tpu.memory_space<vmem>>, vector<8x16x16xf32>,
    %c2_63 = arith.constant 2 : index
    %c0_64 = arith.constant 0 : index
    %c0_65 = arith.constant 0 : index
    %60 = vector.load %arg10[%c2_63, %c0_64, %c0_65] : memref<10x18x16xf32, #tpu.memory_space<vmem>>, vector<8x16x16xf32>
    %c0_66 = arith.constant 0 : index
    %c0_67 = arith.constant 0 : index
    %c96 = arith.constant 96 : index
    %61 = vector.load %arg11[%c0_66, %c0_67, %c96] : memref<8x16x144xf32, #tpu.memory_space<vmem>>, vector<8x16x16xf32>
    tpu.vector_store %arg11[%c0_66, %c0_67, %c96], %60 {strides = array<i32>} : memref<8x16x144xf32, #tpu.memory_space<vmem>>, vector<8x16x16xf32>,
    %c2_68 = arith.constant 2 : index
    %c1_69 = arith.constant 1 : index
    %c0_70 = arith.constant 0 : index
    %62 = vector.load %arg10[%c2_68, %c1_69, %c0_70] : memref<10x18x16xf32, #tpu.memory_space<vmem>>, vector<8x16x16xf32>
    %c0_71 = arith.constant 0 : index
    %c0_72 = arith.constant 0 : index
    %c112 = arith.constant 112 : index
    %63 = vector.load %arg11[%c0_71, %c0_72, %c112] : memref<8x16x144xf32, #tpu.memory_space<vmem>>, vector<8x16x16xf32>
    tpu.vector_store %arg11[%c0_71, %c0_72, %c112], %62 {strides = array<i32>} : memref<8x16x144xf32, #tpu.memory_space<vmem>>, vector<8x16x16xf32>,
    %c2_73 = arith.constant 2 : index
    %c2_74 = arith.constant 2 : index
    %c0_75 = arith.constant 0 : index
    %64 = vector.load %arg10[%c2_73, %c2_74, %c0_75] : memref<10x18x16xf32, #tpu.memory_space<vmem>>, vector<8x16x16xf32>
    %c0_76 = arith.constant 0 : index
    %c0_77 = arith.constant 0 : index
    %c128 = arith.constant 128 : index
    %65 = vector.load %arg11[%c0_76, %c0_77, %c128] : memref<8x16x144xf32, #tpu.memory_space<vmem>>, vector<8x16x16xf32>
    tpu.vector_store %arg11[%c0_76, %c0_77, %c128], %64 {strides = array<i32>} : memref<8x16x144xf32, #tpu.memory_space<vmem>>, vector<8x16x16xf32>,
    %c0_78 = arith.constant 0 : index
    %c0_79 = arith.constant 0 : index
    %c0_80 = arith.constant 0 : index
    %66 = vector.load %arg11[%c0_78, %c0_79, %c0_80] : memref<8x16x144xf32, #tpu.memory_space<vmem>>, vector<8x16x144xf32>
    %67 = vector.shape_cast %66 : vector<8x16x144xf32> to vector<128x144xf32>
    %c0_81 = arith.constant 0 : index
    %c0_82 = arith.constant 0 : index
    %68 = vector.load %arg8[%c0_81, %c0_82] : memref<144x4xf32, #tpu.memory_space<vmem>>, vector<144x4xf32>
    %cst_83 = arith.constant dense<0.000000e+00> : vector<128x4xf32>
    %69 = tpu.matmul %67, %68, %cst_83 {dimension_numbers = #tpu.dot_dimension_numbers<[1], [0], [0], [1], [0, 0, 1, 1], [], []>} : vector<128x144xf32>, vector<144x4xf32>, vector<128x4xf32> -> vector<128x4xf32>
    %c0_84 = arith.constant 0 : index
    %c0_85 = arith.constant 0 : index
    %c0_86 = arith.constant 0 : index
    %c0_87 = arith.constant 0 : index
    %70 = vector.load %arg9[%c0_84, %c0_85, %c0_86, %c0_87] : memref<1x8x16x8xf32, #tpu.memory_space<vmem>>, vector<1x8x16x4xf32>
    %71 = vector.shape_cast %70 : vector<1x8x16x4xf32> to vector<8x16x4xf32>
    %72 = vector.shape_cast %11 : vector<8x16x4xf32> to vector<1x8x16x4xf32>
    tpu.vector_store %arg9[%c0_84, %c0_85, %c0_86, %c0_87], %72 {strides = array<i32>} : memref<1x8x16x8xf32, #tpu.memory_space<vmem>>, vector<1x8x16x4xf32>,
    %73 = vector.shape_cast %69 : vector<128x4xf32> to vector<8x16x4xf32>
    %c0_88 = arith.constant 0 : index
    %c0_89 = arith.constant 0 : index
    %c0_90 = arith.constant 0 : index
    %c4 = arith.constant 4 : index
    %74 = vector.load %arg9[%c0_88, %c0_89, %c0_90, %c4] : memref<1x8x16x8xf32, #tpu.memory_space<vmem>>, vector<1x8x16x4xf32>
    %75 = vector.shape_cast %74 : vector<1x8x16x4xf32> to vector<8x16x4xf32>
    %76 = vector.shape_cast %73 : vector<8x16x4xf32> to vector<1x8x16x4xf32>
    tpu.vector_store %arg9[%c0_88, %c0_89, %c0_90, %c4], %76 {strides = array<i32>} : memref<1x8x16x8xf32, #tpu.memory_space<vmem>>, vector<1x8x16x4xf32>,
    return
  }
  func.func @transform_0(%arg0: i32, %arg1: i32) -> (i32, i32, i32, i32) {
    %c0_i32 = arith.constant 0 : i32
    %c0_i32_0 = arith.constant 0 : i32
    %c0_i32_1 = arith.constant 0 : i32
    %c0_i32_2 = arith.constant 0 : i32
    return %arg0, %c0_i32, %c0_i32_0, %c0_i32_1 : i32, i32, i32, i32
  }
  func.func @transform_1(%arg0: i32, %arg1: i32) -> (i32, i32) {
    %c0_i32 = arith.constant 0 : i32
    %c0_i32_0 = arith.constant 0 : i32
    %c0_i32_1 = arith.constant 0 : i32
    return %c0_i32, %c0_i32_0 : i32, i32
  }
  func.func @transform_2(%arg0: i32, %arg1: i32) -> (i32, i32) {
    %c0_i32 = arith.constant 0 : i32
    %c0_i32_0 = arith.constant 0 : i32
    %c0_i32_1 = arith.constant 0 : i32
    return %c0_i32, %c0_i32_0 : i32, i32
  }
  func.func @transform_3(%arg0: i32, %arg1: i32) -> (i32, i32) {
    %c0_i32 = arith.constant 0 : i32
    %c0_i32_0 = arith.constant 0 : i32
    %c0_i32_1 = arith.constant 0 : i32
    return %c0_i32, %c0_i32_0 : i32, i32
  }
  func.func @transform_4(%arg0: i32, %arg1: i32) -> (i32, i32) {
    %c0_i32 = arith.constant 0 : i32
    %c0_i32_0 = arith.constant 0 : i32
    %c0_i32_1 = arith.constant 0 : i32
    return %c0_i32, %c0_i32_0 : i32, i32
  }
  func.func @transform_5(%arg0: i32, %arg1: i32) -> (i32, i32) {
    %c0_i32 = arith.constant 0 : i32
    %c0_i32_0 = arith.constant 0 : i32
    %c0_i32_1 = arith.constant 0 : i32
    return %c0_i32, %c0_i32_0 : i32, i32
  }
  func.func @transform_6(%arg0: i32, %arg1: i32) -> (i32, i32) {
    %c0_i32 = arith.constant 0 : i32
    %c0_i32_0 = arith.constant 0 : i32
    %c0_i32_1 = arith.constant 0 : i32
    return %c0_i32, %c0_i32_0 : i32, i32
  }
  func.func @transform_7(%arg0: i32, %arg1: i32) -> (i32, i32, i32, i32) {
    %c0_i32 = arith.constant 0 : i32
    %c0_i32_0 = arith.constant 0 : i32
    %c0_i32_1 = arith.constant 0 : i32
    return %arg0, %arg1, %c0_i32, %c0_i32_0 : i32, i32, i32, i32
  }
}

</mosaic_0001>

<bundles_post_ra>
// kernel: tpu_custom_call.1
= control target key start
LH: loop header
LB: loop body
LE: loop exit
PB: predicated region body
PF: predicated region fallthrough
CT: control target
= control target key end

     0   :  { %s2261_s24 = smov 0   ;;  %s2263_s25 = smov 0   ;;  %s3208_s0 = inlined_call_operand.vmem [shape: f32[2,16,16,4], index: 0, kind: input, shape index: {}]   ;;  %s3209_s1 = inlined_call_operand.vmem [shape: f32[1,4], index: 1, kind: input, shape index: {}]   ;;  %s3210_s2 = inlined_call_operand.vmem [shape: f32[1,4], index: 2, kind: input, shape index: {}]   ;;  %s3211_s3 = inlined_call_operand.vmem [shape: f32[4,16], index: 3, kind: input, shape index: {}]   ;;  %s3212_s4 = inlined_call_operand.vmem [shape: f32[1,16], index: 4, kind: input, shape index: {}]   ;;  %s3213_s5 = inlined_call_operand.vmem [shape: f32[1,16], index: 5, kind: input, shape index: {}]   ;;  %s3214_s6 = inlined_call_operand.vmem [shape: f32[144,4], index: 6, kind: input, shape index: {}]   ;;  %s3215_s7 = inlined_call_operand.vmem [shape: f32[2,16,16,8], index: 7, kind: output, shape index: {}]  }
   0x1   :  { %s2265_s26 = smov 0   ;;  %s2267_s27 = smov 0  }
   0x2   :  { %s2269_s28 = smov 0  }
   0x3 LB: > { %s26_s29 = sadd.s32 1, %s2199_s26  ;;  %s29_s30 = sadd.s32 1, %s2203_s27  ;;  %s2207_s28 = sphi %s2269_s28, %s17_s28   ;;  %s2203_s27 = sphi %s2267_s27, %s3219_s27   ;;  %s2199_s26 = sphi %s2265_s26, %s3218_s26   ;;  %s2195_s25 = sphi %s2263_s25, %s3217_s25   ;;  %s2191_s24 = sphi %s2261_s24, %s3216_s24  }
   0x4   : > { %p27_p0 = scmp.ge.s32.totalorder %s26_s29, 2  ;;  %p1960_p1 = scmp.ge.s32.totalorder %s2207_s28, 1 }
   0x5   : > { %p251_p2 = scmp.lt.s32.totalorder %s2207_s28, 5 }
   0x6   : > { %s3221_s29 = smov (%p27_p0, %s26_s29), 0  ;;  %s3223_s30 = smov (!%p27_p0, %s29_s30), %s2203_s27 }
   0x7   : > { %p252_p3 = pnand %p1960_p1, %p251_p2  ;;  %p31_p4 = scmp.ge.s32.totalorder %s3223_s30, 2 }
   0x8   : > { %v411_v0 = vld [vmem:[%s3211_s3] sm:$0xf] (!%p252_p3)  ;;  %vm473_vm0 = vcmask (!%p252_p3), 1043456   ;;  %p288_p5 = scmp.lt.s32.totalorder (!%p252_p3), %s2195_s25, 1  ;;  %s2297_s10 = sshll.u32 (!%p252_p3), %s2191_s24, 3  ;;  %vm412_vm1 = vcmask (!%p252_p3), 31744  }
   0x9   : > { %s3225_s30 = smov (%p31_p4, %s3223_s30), 0  ;;  %255 = sbr.rel (%p252_p3) target bundleno = 972 (0x3cc), region = 48 }
   0xa   : > { %2040 = vmatprep.subr.msk.mxu0 (!%p252_p3), %vm473_vm0, %v411_v0  ;;  %p296_p6 = scmp.lt.s32.totalorder (!%p252_p3), %s2297_s10, 15  ;;  %s1968_s11 = sadd.s32 (!%p252_p3), 4294967295, %s2297_s10  ;;  %v2316_v1 = vld [vmem:[%s3209_s1] ss:$0 sm:$0xff] (!%p252_p3)  ;;  %vm737_vm2 = vcmask (!%p252_p3), 122880   ;;  %vm716_vm3 = vcmask (!%p252_p3), 130048  }
   0xb   : > { %2041 = vmatpush3.msk.msra.mxu0 (!%p252_p3), %vm473_vm0, %v411_v0  ;;  %p306_p7 = scmp.gt.s32.totalorder (!%p252_p3), %s1968_s11, 0  ;;  %s2018_s9 = sshll.u32 (!%p252_p3), %s2191_s24, 7  ;;  %v2325_v2 = vld [vmem:[%s3210_s2] ss:$0 sm:$0xff] (!%p252_p3) }
   0xc   : > { %p1997_p9 = scmp.ne.s32.totalorder (!%p252_p3), %s2191_s24, 0 }
  0x10   : > { %s3227_s25 = smov (!%p288_p5, %s2195_s25), 1  ;;  %s3229_s11 = smov (!%p306_p7, %s1968_s11), 0 }
  0x11   : > { %s297_s12 = scalar_select %p296_p6, %s2297_s10, 15 }
  0x12   : > { %s1965_s13 = sshll.u32 %s3227_s25, 5  ;;  %s2017_s14 = sshll.u32 %s3227_s25, 8  ;;  %vm764_vm4 = vcmask (!%p1997_p9), 123904  }
  0x13   : > { %s1964_s15 = sshll.u32 %s297_s12, 1  ;;  %s2305_s20 = scalar_lea.vmem %s3208_s0, %s2017_s14 }
  0x14   : > { %s300_s16 = sadd.s32 %s1965_s13, %s1964_s15  ;;  %s1969_s8 = sshll.u32 %s3229_s11, 4 }
  0x15   : > { %s1966_s17 = sshll.u32 %s300_s16, 3  ;;  %s312_s13 = scalar_lea.vmem %s2305_s20, %s1969_s8 }
  0x16   : > { %s2310_s23 = scalar_lea.vmem %s3215_s7, %s1966_s17  ;;  %s2320_s15 = scalar_lea.vmem %s2305_s20, %s2018_s9  ;;  %v313_v3 = vld [vmem:[%s312_s13] sm:$0xff]  ;;  %v314_v4 = vld [vmem:[%s312_s13 + $0x8] sm:$0xff] }
  0x17   : > { %v2328_v5 = vld [vmem:[%s2320_s15] sm:$0xff]  ;;  %v344_v6 = vmul.f32 %v2316_v1, %v313_v3  ;;  %v345_v7 = vmul.f32 %v2316_v1, %v314_v4  ;;  %v2335_v9 = vld [vmem:[%s2320_s15 + $0x8] sm:$0xff]  ;;  %v2338_v10 = vld [vmem:[%s2320_s15 + $0x10] sm:$0xff]  ;;  %s308_s11 = sadd.s32 8, %s2297_s10 }
  0x18   : > { %v346_v8 = vmul.f32 %v2316_v1, %v2328_v5  ;;  %v2341_v11 = vld [vmem:[%s2320_s15 + $0x18] sm:$0xff]  ;;  %v347_v12 = vmul.f32 %v2316_v1, %v2335_v9  ;;  %v348_v13 = vmul.f32 %v2316_v1, %v2338_v10  ;;  %v2348_v14 = vld [vmem:[%s2320_s15 + $0x20] sm:$0xff]  ;;  %v2360_v25 = vld [vmem:[%s2320_s15 + $0x28] sm:$0xff]  ;;  %p309_p8 = scmp.lt.s32.totalorder %s308_s11, 15 }
  0x19   : > { %v371_v15 = vadd.f32 %v2325_v2, %v344_v6  ;;  %v372_v16 = vadd.f32 %v2325_v2, %v345_v7  ;;  %v349_v19 = vmul.f32 %v2316_v1, %v2341_v11  ;;  %v350_v20 = vmul.f32 %v2316_v1, %v2348_v14  ;;  %v2363_v26 = vld [vmem:[%s2320_s15 + $0x30] sm:$0xff]  ;;  %v2376_v33 = vld [vmem:[%s2320_s15 + $0x38] sm:$0xff]  ;;  %v2379_v34 = vld [vmem:[%s2320_s15 + $0x40] sm:$0xff] }
  0x1a   : > { %v373_v17 = vadd.f32 %v2325_v2, %v346_v8  ;;  %v374_v18 = vadd.f32 %v2325_v2, %v347_v12  ;;  %v375_v24 = vadd.f32 %v2325_v2, %v348_v13  ;;  %v351_v29 = vmul.f32 %v2316_v1, %v2360_v25  ;;  %v2390_v41 = vld [vmem:[%s2320_s15 + $0x48] sm:$0xff]  ;;  %v2393_v42 = vld [vmem:[%s2320_s15 + $0x50] sm:$0xff]  ;;  %s3231_s11 = smov (!%p309_p8, %s308_s11), 15  ;;  %v2404_v49 = vld [vmem:[%s2320_s15 + $0x58] sm:$0xff] }
  0x1b   : > { %v391_v21 = vmax.f32 %v371_v15, 0.0  ;;  %v392_v22 = vmax.f32 %v372_v16, 0.0  ;;  %v376_v28 = vadd.f32 %v2325_v2, %v349_v19  ;;  %v377_v31 = vadd.f32 %v2325_v2, %v350_v20  ;;  %v2407_v50 = vld [vmem:[%s2320_s15 + $0x60] sm:$0xff]  ;;  %s1971_s10 = sshll.u32 %s3231_s11, 4  ;;  %v2418_v57 = vld [vmem:[%s2320_s15 + $0x68] sm:$0xff]  ;;  %v2421_v58 = vld [vmem:[%s2320_s15 + $0x70] sm:$0xff] }
  0x1c   : > { %v393_v23 = vmax.f32 %v373_v17, 0.0  ;;  %v394_v27 = vmax.f32 %v374_v18, 0.0  ;;  %v395_v30 = vmax.f32 %v375_v24, 0.0  ;;  %v352_v32 = vmul.f32 %v2316_v1, %v2363_v26  ;;  %s334_s17 = scalar_lea.vmem %s2305_s20, %s1971_s10  ;;  %v2433_v3 = vld [vmem:[%s2320_s15 + $0x78] sm:$0xff] }
  0x1d   : > { %2042 = vmatprep.mubr.msk.f32.mxu0 %vm412_vm1, %v391_v21  ;;  %v396_v35 = vmax.f32 %v376_v28, 0.0  ;;  %v378_v36 = vadd.f32 %v2325_v2, %v351_v29  ;;  %v353_v37 = vmul.f32 %v2316_v1, %v2376_v33  ;;  %v397_v38 = vmax.f32 %v377_v31, 0.0  ;;  %v335_v4 = vld [vmem:[%s334_s17] sm:$0xff]  ;;  %v336_v16 = vld [vmem:[%s334_s17 + $0x8] sm:$0xff] }
  0x1e   : > { %2043 = vmatmul.mubr.msk.f32.vlgmr.msra.gmra.mrb[0].mxu0 %vm412_vm1, %v392_v22  ;;  %v379_v39 = vadd.f32 %v2325_v2, %v352_v32  ;;  %v354_v40 = vmul.f32 %v2316_v1, %v2379_v34  ;;  %v355_v45 = vmul.f32 %v2316_v1, %v2390_v41  ;;  %v356_v48 = vmul.f32 %v2316_v1, %v2393_v42  ;;  %v2481_v29 = vld [vmem:[%s3213_s5] ss:$0 sm:$0xff] }
  0x1f   : > { %2045 = vmatprep.mubr.msk.f32.mxu0 %vm412_vm1, %v393_v23  ;;  %v398_v43 = vmax.f32 %v378_v36, 0.0  ;;  %v380_v44 = vadd.f32 %v2325_v2, %v353_v37  ;;  %v357_v53 = vmul.f32 %v2316_v1, %v2404_v49  ;;  %v358_v56 = vmul.f32 %v2316_v1, %v2407_v50 }
  0x20   : > { %v399_v46 = vmax.f32 %v379_v39, 0.0  ;;  %v381_v47 = vadd.f32 %v2325_v2, %v354_v40  ;;  %v382_v52 = vadd.f32 %v2325_v2, %v355_v45  ;;  %v383_v55 = vadd.f32 %v2325_v2, %v356_v48 }
  0x21   : > { %v400_v51 = vmax.f32 %v380_v44, 0.0  ;;  %v384_v60 = vadd.f32 %v2325_v2, %v357_v53  ;;  %v359_v61 = vmul.f32 %v2316_v1, %v2418_v57  ;;  %v385_v63 = vadd.f32 %v2325_v2, %v358_v56 }
  0x22   : > { %2046 = vmatmul.mubr.msk.f32.gmra.mrb[2].mxu0 %vm412_vm1, %v394_v27  ;;  %v401_v54 = vmax.f32 %v381_v47, 0.0  ;;  %v402_v59 = vmax.f32 %v382_v52, 0.0  ;;  %v403_v62 = vmax.f32 %v383_v55, 0.0  ;;  %v360_v0 = vmul.f32 %v2316_v1, %v2421_v58 }
  0x23   : > { %2048 = vmatprep.mubr.msk.f32.mxu0 %vm412_vm1, %v395_v30  ;;  %v404_v6 = vmax.f32 %v384_v60, 0.0  ;;  %v386_v7 = vadd.f32 %v2325_v2, %v359_v61  ;;  %v361_v8 = vmul.f32 %v2316_v1, %v2433_v3  ;;  %v405_v12 = vmax.f32 %v385_v63, 0.0 }
  0x24   : > { %v387_v13 = vadd.f32 %v2325_v2, %v360_v0  ;;  %v362_v15 = vmul.f32 %v2316_v1, %v335_v4  ;;  %v363_v19 = vmul.f32 %v2316_v1, %v336_v16  ;;  %v2209_v1 = vmov 0.0  }
  0x25   : > { %v406_v17 = vmax.f32 %v386_v7, 0.0  ;;  %v388_v18 = vadd.f32 %v2325_v2, %v361_v8  ;;  %738 = vst.msk [vmem:[#allocation2] sm:$0x1] %vm737_vm2, %v2209_v1  ;;  %739 = vst.msk [vmem:[#allocation2 + $0x18] sm:$0x1] %vm737_vm2, %v2209_v1 }
  0x26   : > { %2049 = vmatmul.mubr.msk.f32.gmra.mrb[4].mxu0 %vm412_vm1, %v396_v35  ;;  %v407_v20 = vmax.f32 %v387_v13, 0.0  ;;  %v389_v21 = vadd.f32 %v2325_v2, %v362_v15  ;;  %v390_v23 = vadd.f32 %v2325_v2, %v363_v19  ;;  %740 = vst.msk [vmem:[#allocation2 + $0x30] sm:$0x1] %vm737_vm2, %v2209_v1  ;;  %741 = vst.msk [vmem:[#allocation2 + $0x48] sm:$0x1] %vm737_vm2, %v2209_v1 }
  0x27   : > { %2051 = vmatprep.mubr.msk.f32.mxu0 %vm412_vm1, %v397_v38  ;;  %v408_v22 = vmax.f32 %v388_v18, 0.0  ;;  %742 = vst.msk [vmem:[#allocation2 + $0x60] sm:$0x1] %vm737_vm2, %v2209_v1  ;;  %743 = vst.msk [vmem:[#allocation2 + $0x78] sm:$0x1] %vm737_vm2, %v2209_v1 }
  0x28   : > { %v409_v24 = vmax.f32 %v389_v21, 0.0  ;;  %v410_v27 = vmax.f32 %v390_v23, 0.0  ;;  %744 = vst.msk [vmem:[#allocation2 + $0x90] sm:$0x1] %vm737_vm2, %v2209_v1  ;;  %745 = vst.msk [vmem:[#allocation2 + $0xa8] sm:$0x1] %vm737_vm2, %v2209_v1 }
  0x29   : > { %746 = vst.msk [vmem:[#allocation2 + $0xc0] sm:$0x1] %vm737_vm2, %v2209_v1  ;;  %747 = vst.msk [vmem:[#allocation2 + $0xd8] sm:$0x1] %vm737_vm2, %v2209_v1  ;;  %v2476_v2 = vld [vmem:[%s3212_s4] ss:$0 sm:$0xff] }
  0x2a   : > { %2052 = vmatmul.mubr.msk.f32.gmra.mrb[6].mxu0 %vm412_vm1, %v398_v43  ;;  %748 = vst.msk [vmem:[#allocation2 + $0x11] sm:$0x1] %vm737_vm2, %v2209_v1  ;;  %749 = vst.msk [vmem:[#allocation2 + $0x29] sm:$0x1] %vm737_vm2, %v2209_v1 }
  0x2b   : > { %2054 = vmatprep.mubr.msk.f32.mxu0 %vm412_vm1, %v399_v46  ;;  %750 = vst.msk [vmem:[#allocation2 + $0x41] sm:$0x1] %vm737_vm2, %v2209_v1  ;;  %751 = vst.msk [vmem:[#allocation2 + $0x59] sm:$0x1] %vm737_vm2, %v2209_v1 }
  0x2c   : > { %752 = vst.msk [vmem:[#allocation2 + $0x71] sm:$0x1] %vm737_vm2, %v2209_v1  ;;  %753 = vst.msk [vmem:[#allocation2 + $0x89] sm:$0x1] %vm737_vm2, %v2209_v1 }
  0x2d   : > { %754 = vst.msk [vmem:[#allocation2 + $0xa1] sm:$0x1] %vm737_vm2, %v2209_v1  ;;  %755 = vst.msk [vmem:[#allocation2 + $0xb9] sm:$0x1] %vm737_vm2, %v2209_v1 }
  0x2e   : > { %2055 = vmatmul.mubr.msk.f32.gmra.mrb[8].mxu0 %vm412_vm1, %v400_v51  ;;  %756 = vst.msk [vmem:[#allocation2 + $0xd1] sm:$0x1] %vm737_vm2, %v2209_v1  ;;  %757 = vst.msk [vmem:[#allocation2 + $0xe9] sm:$0x1] %vm737_vm2, %v2209_v1 }
  0x2f   : > { %2057 = vmatprep.mubr.msk.f32.mxu0 %vm412_vm1, %v401_v54 }
  0x32   : > { %2058 = vmatmul.mubr.msk.f32.gmra.mrb[10].mxu0 %vm412_vm1, %v402_v59 }
  0x33   : > { %2060 = vmatprep.mubr.msk.f32.mxu0 %vm412_vm1, %v403_v62 }
  0x36   : > { %2061 = vmatmul.mubr.msk.f32.gmra.mrb[12].mxu0 %vm412_vm1, %v404_v6 }
  0x37   : > { %2063 = vmatprep.mubr.msk.f32.mxu0 %vm412_vm1, %v405_v12 }
  0x3a   : > { %2064 = vmatmul.mubr.msk.f32.gmra.mrb[14].mxu0 %vm412_vm1, %v406_v17 }
  0x3b   : > { %2066 = vmatprep.mubr.msk.f32.mxu0 %vm412_vm1, %v407_v20 }
  0x3e   : > { %2067 = vmatmul.mubr.msk.f32.gmra.mrb[16].mxu0 %vm412_vm1, %v408_v22 }
  0x3f   : > { %2069 = vmatprep.mubr.msk.f32.mxu0 %vm412_vm1, %v409_v24 }
  0x42   : > { %2070 = vmatmul.mubr.msk.f32.gmra.mrb[18].mxu0 %vm412_vm1, %v410_v27 }
  0xf1   : > { %v2044_v28 = vpop.f32.mrb[0].mxu0 }
  0xf2   : > { %v650_v30 = vmul.f32 %v2044_v28, %v2476_v2  ;;  %v543_v31 = vpop.f32.mrb[1].mxu0 }
  0xf3   : > { %v649_v32 = vmul.f32 %v2476_v2, %v543_v31 }
  0xf4   : > { %v677_v35 = vadd.f32 %v2481_v29, %v650_v30 }
  0xf5   : > { %v676_v36 = vadd.f32 %v2481_v29, %v649_v32  ;;  %v2047_v37 = vpop.f32.mrb[2].mxu0 }
  0xf6   : > { %v697_v38 = vmax.f32 %v677_v35, 0.0  ;;  %v652_v39 = vmul.f32 %v2047_v37, %v2476_v2  ;;  %v553_v40 = vpop.f32.mrb[3].mxu0 }
  0xf7   : > { %v696_v43 = vmax.f32 %v676_v36, 0.0  ;;  %v651_v44 = vmul.f32 %v2476_v2, %v553_v40 }
  0xf8   : > { %718 = vst.msk [vmem:[#allocation2 + $0x9] sm:$0xff] %vm716_vm3, %v697_v38  ;;  %v679_v45 = vadd.f32 %v2481_v29, %v652_v39 }
  0xf9   : > { %717 = vst.msk [vmem:[#allocation2 + $0x1] sm:$0xff] %vm716_vm3, %v696_v43  ;;  %v678_v46 = vadd.f32 %v2481_v29, %v651_v44  ;;  %v2050_v47 = vpop.f32.mrb[4].mxu0 }
  0xfa   : > { %v699_v48 = vmax.f32 %v679_v45, 0.0  ;;  %v654_v51 = vmul.f32 %v2050_v47, %v2476_v2  ;;  %v563_v52 = vpop.f32.mrb[5].mxu0 }
  0xfb   : > { %v698_v53 = vmax.f32 %v678_v46, 0.0  ;;  %v653_v54 = vmul.f32 %v2476_v2, %v563_v52 }
  0xfc   : > { %720 = vst.msk [vmem:[#allocation2 + $0x21] sm:$0xff] %vm716_vm3, %v699_v48  ;;  %v681_v55 = vadd.f32 %v2481_v29, %v654_v51 }
  0xfd   : > { %719 = vst.msk [vmem:[#allocation2 + $0x19] sm:$0xff] %vm716_vm3, %v698_v53  ;;  %v680_v56 = vadd.f32 %v2481_v29, %v653_v54  ;;  %v2053_v59 = vpop.f32.mrb[6].mxu0 }
  0xfe   : > { %v701_v60 = vmax.f32 %v681_v55, 0.0  ;;  %v656_v61 = vmul.f32 %v2053_v59, %v2476_v2  ;;  %v573_v62 = vpop.f32.mrb[7].mxu0 }
  0xff   : > { %v700_v63 = vmax.f32 %v680_v56, 0.0  ;;  %v655_v0 = vmul.f32 %v2476_v2, %v573_v62 }
 0x100   : > { %722 = vst.msk [vmem:[#allocation2 + $0x39] sm:$0xff] %vm716_vm3, %v701_v60  ;;  %v683_v4 = vadd.f32 %v2481_v29, %v656_v61 }
 0x101   : > { %721 = vst.msk [vmem:[#allocation2 + $0x31] sm:$0xff] %vm716_vm3, %v700_v63  ;;  %v682_v6 = vadd.f32 %v2481_v29, %v655_v0  ;;  %v2056_v7 = vpop.f32.mrb[8].mxu0 }
 0x102   : > { %v703_v8 = vmax.f32 %v683_v4, 0.0  ;;  %v658_v12 = vmul.f32 %v2056_v7, %v2476_v2  ;;  %v583_v13 = vpop.f32.mrb[9].mxu0 }
 0x103   : > { %v702_v15 = vmax.f32 %v682_v6, 0.0  ;;  %v657_v16 = vmul.f32 %v2476_v2, %v583_v13 }
 0x104   : > { %724 = vst.msk [vmem:[#allocation2 + $0x51] sm:$0xff] %vm716_vm3, %v703_v8  ;;  %v685_v17 = vadd.f32 %v2481_v29, %v658_v12 }
 0x105   : > { %723 = vst.msk [vmem:[#allocation2 + $0x49] sm:$0xff] %vm716_vm3, %v702_v15  ;;  %v684_v18 = vadd.f32 %v2481_v29, %v657_v16  ;;  %v2059_v19 = vpop.f32.mrb[10].mxu0  ;;  %v2210_v15 = vmov (!%p1997_p9), 0.0  }
 0x106   : > { %v705_v20 = vmax.f32 %v685_v17, 0.0  ;;  %v660_v21 = vmul.f32 %v2059_v19, %v2476_v2  ;;  %v593_v22 = vpop.f32.mrb[11].mxu0  ;;  %762 = vst.msk [vmem:[#allocation2] sm:$0xff] (!%p1997_p9), %vm716_vm3, %v2210_v15  ;;  %763 = vst.msk [vmem:[#allocation2 + $0x8] sm:$0xff] (!%p1997_p9), %vm716_vm3, %v2210_v15 }
 0x107   : > { %v704_v23 = vmax.f32 %v684_v18, 0.0  ;;  %v659_v24 = vmul.f32 %v2476_v2, %v593_v22  ;;  %765 = vst.msk [vmem:[#allocation2 + $0x10] sm:$0x3] (!%p1997_p9), %vm764_vm4, %v2210_v15 }
 0x108   : > { %726 = vst.msk [vmem:[#allocation2 + $0x69] sm:$0xff] %vm716_vm3, %v705_v20  ;;  %v687_v27 = vadd.f32 %v2481_v29, %v660_v21 }
 0x109   : > { %725 = vst.msk [vmem:[#allocation2 + $0x61] sm:$0xff] %vm716_vm3, %v704_v23  ;;  %v686_v1 = vadd.f32 %v2481_v29, %v659_v24  ;;  %v2062_v28 = vpop.f32.mrb[12].mxu0 }
 0x10a   : > { %v707_v30 = vmax.f32 %v687_v27, 0.0  ;;  %v662_v31 = vmul.f32 %v2062_v28, %v2476_v2  ;;  %v603_v32 = vpop.f32.mrb[13].mxu0 }
 0x10b   : > { %v706_v35 = vmax.f32 %v686_v1, 0.0  ;;  %v661_v36 = vmul.f32 %v2476_v2, %v603_v32 }
 0x10c   : > { %728 = vst.msk [vmem:[#allocation2 + $0x81] sm:$0xff] %vm716_vm3, %v707_v30  ;;  %v689_v37 = vadd.f32 %v2481_v29, %v662_v31 }
 0x10d   : > { %727 = vst.msk [vmem:[#allocation2 + $0x79] sm:$0xff] %vm716_vm3, %v706_v35  ;;  %v688_v38 = vadd.f32 %v2481_v29, %v661_v36  ;;  %v2065_v39 = vpop.f32.mrb[14].mxu0 }
 0x10e   : > { %v709_v40 = vmax.f32 %v689_v37, 0.0  ;;  %v664_v43 = vmul.f32 %v2065_v39, %v2476_v2  ;;  %v613_v44 = vpop.f32.mrb[15].mxu0 }
 0x10f   : > { %v708_v45 = vmax.f32 %v688_v38, 0.0  ;;  %v663_v46 = vmul.f32 %v2476_v2, %v613_v44 }
 0x110   : > { %730 = vst.msk [vmem:[#allocation2 + $0x99] sm:$0xff] %vm716_vm3, %v709_v40  ;;  %v691_v47 = vadd.f32 %v2481_v29, %v664_v43 }
 0x111   : > { %729 = vst.msk [vmem:[#allocation2 + $0x91] sm:$0xff] %vm716_vm3, %v708_v45  ;;  %v690_v48 = vadd.f32 %v2481_v29, %v663_v46  ;;  %v2068_v51 = vpop.f32.mrb[16].mxu0 }
 0x112   : > { %v711_v52 = vmax.f32 %v691_v47, 0.0  ;;  %v666_v53 = vmul.f32 %v2068_v51, %v2476_v2  ;;  %v623_v54 = vpop.f32.mrb[17].mxu0 }
 0x113   : > { %v710_v55 = vmax.f32 %v690_v48, 0.0  ;;  %v665_v56 = vmul.f32 %v2476_v2, %v623_v54 }
 0x114   : > { %732 = vst.msk [vmem:[#allocation2 + $0xb1] sm:$0xff] %vm716_vm3, %v711_v52  ;;  %v693_v59 = vadd.f32 %v2481_v29, %v666_v53 }
 0x115   : > { %731 = vst.msk [vmem:[#allocation2 + $0xa9] sm:$0xff] %vm716_vm3, %v710_v55  ;;  %v692_v60 = vadd.f32 %v2481_v29, %v665_v56  ;;  %v2071_v61 = vpop.f32.mrb[18].mxu0 }
 0x116   : > { %v713_v62 = vmax.f32 %v693_v59, 0.0  ;;  %v668_v63 = vmul.f32 %v2071_v61, %v2476_v2  ;;  %v633_v0 = vpop.f32.mrb[19].mxu0 }
 0x117   : > { %v712_v4 = vmax.f32 %v692_v60, 0.0  ;;  %v667_v6 = vmul.f32 %v2476_v2, %v633_v0  ;;  %761 = sbr.rel (%p1997_p9) target bundleno = 286 (0x11e), region = 52 }
 0x118   : > { %734 = vst.msk [vmem:[#allocation2 + $0xc9] sm:$0xff] %vm716_vm3, %v713_v62  ;;  %v695_v7 = vadd.f32 %v2481_v29, %v668_v63 }
 0x119   : > { %733 = vst.msk [vmem:[#allocation2 + $0xc1] sm:$0xff] %vm716_vm3, %v712_v4  ;;  %v694_v8 = vadd.f32 %v2481_v29, %v667_v6 }
 0x11a   : > { %v715_v12 = vmax.f32 %v695_v7, 0.0 }
 0x11b   : > { %v714_v13 = vmax.f32 %v694_v8, 0.0 }
 0x11c   : > { %736 = vst.msk [vmem:[#allocation2 + $0xe1] sm:$0xff] %vm716_vm3, %v715_v12 }
 0x11d   : > { %735 = vst.msk [vmem:[#allocation2 + $0xd9] sm:$0xff] %vm716_vm3, %v714_v13 }
 0x11e PF: > { %p1998_p10 = scmp.ne.s32.totalorder %s2191_s24, 1 }
 0x11f   : > { %vm773_vm5 = vcmask (!%p1998_p10), 123904   ;;  %v2211_v2 = vmov (!%p1998_p10), 0.0  }
 0x120   : > { %769 = sbr.rel (%p1998_p10) target bundleno = 295 (0x127), region = 56  ;;  %771 = vst.msk [vmem:[#allocation2 + $0xd8] sm:$0xff] (!%p1998_p10), %vm716_vm3, %v2211_v2  ;;  %772 = vst.msk [vmem:[#allocation2 + $0xe0] sm:$0xff] (!%p1998_p10), %vm716_vm3, %v2211_v2 }
 0x121   : > { %774 = vst.msk [vmem:[#allocation2 + $0xe8] sm:$0x3] (!%p1998_p10), %vm773_vm5, %v2211_v2 }
 0x127 PF: > { %v2549_v29 = vld [vmem:[#allocation2 + $0x51] sm:$0xff]  ;;  %v2551_v16 = vld [vmem:[#allocation2 + $0x68] sm:$0xff]  ;;  %1770 = vst.msk [vmem:[%s2310_s23 + $0x38] sm:$0xff] %vm412_vm1, %v2376_v33  ;;  %1763 = vst.msk [vmem:[%s2310_s23] sm:$0xff] %vm412_vm1, %v2328_v5  ;;  %s2212_s24 = smov 16   ;;  %s2213_s22 = smov 48  }
 0x128   : > { %1771 = vst.msk [vmem:[%s2310_s23 + $0x40] sm:$0xff] %vm412_vm1, %v2379_v34  ;;  %1764 = vst.msk [vmem:[%s2310_s23 + $0x8] sm:$0xff] %vm412_vm1, %v2335_v9  ;;  %853 = vrot.lane.b32.xlu0 %v2549_v29, %s2212_s24  ;;  %1048 = vrot.lane.b32.xlu1 %v2551_v16, %s2213_s22  ;;  %v2605_v5 = vld [vmem:[#allocation2 + $0x52] sm:$0xff]  ;;  %v2609_v9 = vld [vmem:[#allocation2 + $0x69] sm:$0xff]  ;;  %s2215_s8 = smov 32   ;;  %s2216_s9 = smov 64  }
 0x129   : > { %1772 = vst.msk [vmem:[%s2310_s23 + $0x48] sm:$0xff] %vm412_vm1, %v2390_v41  ;;  %1765 = vst.msk [vmem:[%s2310_s23 + $0x10] sm:$0xff] %vm412_vm1, %v2338_v10  ;;  %v2611_v10 = vld [vmem:[#allocation2 + $0x80] sm:$0xff]  ;;  %v2633_v34 = vld [vmem:[#allocation2 + $0x6a] sm:$0xff]  ;;  %s2217_s25 = smov 80   ;;  %s2218_s10 = smov 96  }
 0x12a   : > { %1773 = vst.msk [vmem:[%s2310_s23 + $0x50] sm:$0xff] %vm412_vm1, %v2393_v42  ;;  %1766 = vst.msk [vmem:[%s2310_s23 + $0x18] sm:$0xff] %vm412_vm1, %v2341_v11  ;;  %v2613_v11 = vld [vmem:[#allocation2 + $0x78] sm:$0xff]  ;;  %v2631_v33 = vld [vmem:[#allocation2 + $0x61] sm:$0xff]  ;;  %s2219_s13 = smov 112   ;;  %vm887_vm6 = vcmask 261248  }
 0x12b   : > { %1774 = vst.msk [vmem:[%s2310_s23 + $0x58] sm:$0xff] %vm412_vm1, %v2404_v49  ;;  %1767 = vst.msk [vmem:[%s2310_s23 + $0x20] sm:$0xff] %vm412_vm1, %v2348_v14  ;;  %v2214_v14 = vmov 0.0|0.0   ;;  %v2635_v41 = vld [vmem:[#allocation2 + $0x82] sm:$0xff]  ;;  %v2639_v42 = vld [vmem:[#allocation2 + $0x30] sm:$0xff]  ;;  %vm984_vm7 = vcmask 392448  }
 0x12c   : > { %1775 = vst.msk [vmem:[%s2310_s23 + $0x60] sm:$0xff] %vm412_vm1, %v2407_v50  ;;  %1768 = vst.msk [vmem:[%s2310_s23 + $0x28] sm:$0xff] %vm412_vm1, %v2360_v25  ;;  %2099 = vmatprep.subr.bf16.mxu1 %v2214_v14  ;;  %2072 = vmatprep.subr.bf16.mxu0 %v2214_v14  ;;  %v2621_v25 = vld [vmem:[#allocation2 + $0x90] sm:$0xff]  ;;  %v2641_v49 = vld [vmem:[#allocation2 + $0x98] sm:$0xff]  ;;  %vm1082_vm8 = vcmask 523648   ;;  %vm1179_vm9 = vcmask 654848  }
 0x12d   : > { %1776 = vst.msk [vmem:[%s2310_s23 + $0x68] sm:$0xff] %vm412_vm1, %v2418_v57  ;;  %1769 = vst.msk [vmem:[%s2310_s23 + $0x30] sm:$0xff] %vm412_vm1, %v2363_v26  ;;  %950 = vrot.lane.b32.xlu0 %v2605_v5, %s2215_s8  ;;  %1145 = vrot.lane.b32.xlu1 %v2609_v9, %s2216_s9  ;;  %v2627_v26 = vld [vmem:[#allocation2 + $0x18] sm:$0xff]  ;;  %v2645_v50 = vld [vmem:[#allocation2 + $0x20] sm:$0xff]  ;;  %vm1276_vm10 = vcmask 786048   ;;  %vm1374_vm11 = vcmask 917248  }
 0x12e   : > { %1778 = vst.msk [vmem:[%s2310_s23 + $0x78] sm:$0xff] %vm412_vm1, %v2433_v3  ;;  %1777 = vst.msk [vmem:[%s2310_s23 + $0x70] sm:$0xff] %vm412_vm1, %v2421_v58  ;;  %v2655_v57 = vld [vmem:[#allocation2 + $0x92] sm:$0xff]  ;;  %v2659_v58 = vld [vmem:[#allocation2 + $0x62] sm:$0xff]  ;;  %vm1471_vm12 = vcmask 1048448   ;;  %vm1843_vm13 = vcmask 64544  }
 0x12f   : > { %800 = vst.msk [vmem:[#allocation3 + $0x90] sm:$0xff] %vm716_vm3, %v2551_v16  ;;  %801 = vst.msk [vmem:[#allocation3 + $0xa0] sm:$0xff] %vm716_vm3, %v2613_v11  ;;  %v2661_v3 = vld [vmem:[#allocation2 + $0x38] sm:$0xff]  ;;  %v2663_v17 = vld [vmem:[#allocation2 + $0xa8] sm:$0xff] }
 0x130   : > { %802 = vst.msk [vmem:[#allocation3 + $0xb0] sm:$0xff] %vm716_vm3, %v2611_v10  ;;  %803 = vst.msk [vmem:[#allocation3 + $0xc0] sm:$0xff] %vm716_vm3, %v2621_v25  ;;  %v2667_v18 = vld [vmem:[#allocation2 + $0x32] sm:$0xff]  ;;  %v1552_v19 = vld [vmem:[%s3214_s6] sm:$0xff] }
 0x131   : > { %793 = vst.msk [vmem:[#allocation3 + $0x20] sm:$0xff] %vm716_vm3, %v2627_v26  ;;  %1511 = vst.msk [vmem:[#allocation3 + $0x78] sm:$0xff] %vm716_vm3, %v2635_v41  ;;  %855 = vrot.lane.b32.xlu0 %v2631_v33, %s2212_s24  ;;  %1242 = vrot.lane.b32.xlu1 %v2633_v34, %s2217_s25  ;;  %v1553_v20 = vld [vmem:[%s3214_s6 + $0x8] sm:$0xff]  ;;  %v2679_v21 = vld [vmem:[#allocation2 + $0x9a] sm:$0xff] }
 0x132   : > { %795 = vst.msk [vmem:[#allocation3 + $0x40] sm:$0xff] %vm716_vm3, %v2639_v42  ;;  %804 = vst.msk [vmem:[#allocation3 + $0xd0] sm:$0xff] %vm716_vm3, %v2641_v49  ;;  %v1554_v22 = vld [vmem:[%s3214_s6 + $0x10] sm:$0xff]  ;;  %v2073_v23 = vpack.c.bf16 %v1553_v20, %v1552_v19  ;;  %v1555_v24 = vld [vmem:[%s3214_s6 + $0x18] sm:$0xff] }
 0x133   : > { %794 = vst.msk [vmem:[#allocation3 + $0x30] sm:$0xff] %vm716_vm3, %v2645_v50  ;;  %1512 = vst.msk [vmem:[#allocation3 + $0x88] sm:$0xff] %vm716_vm3, %v2655_v57  ;;  %v2693_v27 = vld [vmem:[#allocation2 + $0x48] sm:$0xff]  ;;  %v2695_v1 = vld [vmem:[#allocation2 + $0x50] sm:$0xff]  ;;  %v2076_v31 = vpack.c.bf16 %v1555_v24, %v1554_v22 }
 0x134   : > { %796 = vst.msk [vmem:[#allocation3 + $0x50] sm:$0xff] %vm716_vm3, %v2661_v3  ;;  %805 = vst.msk [vmem:[#allocation3 + $0xe0] sm:$0xff] %vm716_vm3, %v2663_v17  ;;  %v2699_v28 = vld [vmem:[#allocation2 + $0x81] sm:$0xff]  ;;  %v2703_v30 = vld [vmem:[#allocation2 + $0xb0] sm:$0xff]  ;;  %2108 = vmatpush1.bf16.msra.mxu1 %v2073_v23  ;;  %2074 = vmatpush1.bf16.msra.mxu0 %v2073_v23 }
 0x135   : > { %1504 = vst.msk [vmem:[#allocation3 + $0x8] sm:$0xff] %vm716_vm3, %v2667_v18  ;;  %952 = vrot.lane.b32.xlu0 %v2659_v58, %s2215_s8  ;;  %1340 = vrot.lane.b32.xlu1 %v2611_v10, %s2218_s10  ;;  %1513 = vst.msk [vmem:[#allocation3 + $0x98] sm:$0xff] %vm716_vm3, %v2679_v21  ;;  %v1556_v32 = vld [vmem:[%s3214_s6 + $0x20] sm:$0xff]  ;;  %v1557_v35 = vld [vmem:[%s3214_s6 + $0x28] sm:$0xff] }
 0x136   : > { %798 = vst.msk [vmem:[#allocation3 + $0x70] sm:$0xff] %vm716_vm3, %v2695_v1  ;;  %797 = vst.msk [vmem:[#allocation3 + $0x60] sm:$0xff] %vm716_vm3, %v2693_v27  ;;  %2100 = vmatprep.subr.bf16.mxu1 %v2214_v14  ;;  %v2716_v36 = vld [vmem:[#allocation2 + $0x60] sm:$0xff]  ;;  %2075 = vmatprep.subr.bf16.mxu0 %v2214_v14  ;;  %v2079_v40 = vpack.c.bf16 %v1557_v35, %v1556_v32  ;;  %v2729_v43 = vld [vmem:[#allocation2 + $0xaa] sm:$0xff] }
 0x137   : > { %806 = vst.msk [vmem:[#allocation3 + $0xf0] sm:$0xff] %vm716_vm3, %v2703_v30  ;;  %799 = vst.msk [vmem:[#allocation3 + $0x80] sm:$0xff] %vm716_vm3, %v2716_v36  ;;  %v2725_v37 = vld [vmem:[#allocation2 + $0x79] sm:$0xff]  ;;  %v807_v38 = vld [vmem:[#allocation2 + $0x1] sm:$0xff] }
 0x138   : > { %v2727_v39 = vld [vmem:[#allocation2 + $0x3a] sm:$0xff]  ;;  %2109 = vmatpush1.bf16.msra.mxu1 %v2076_v31  ;;  %2077 = vmatpush1.bf16.msra.mxu0 %v2076_v31  ;;  %v1558_v44 = vld [vmem:[%s3214_s6 + $0x30] sm:$0xff]  ;;  %1514 = vst.msk [vmem:[#allocation3 + $0xa8] sm:$0xff] %vm716_vm3, %v2729_v43  ;;  %v1535_v47 = vld [vmem:[#allocation3 + $0x78] sm:$0xff] }
 0x139   : > { %1050 = vrot.lane.b32.xlu0 %v2613_v11, %s2213_s22  ;;  %1437 = vrot.lane.b32.xlu1 %v2699_v28, %s2219_s13  ;;  %1505 = vst.msk [vmem:[#allocation3 + $0x18] sm:$0xff] %vm716_vm3, %v2727_v39  ;;  %v1559_v45 = vld [vmem:[%s3214_s6 + $0x38] sm:$0xff]  ;;  %v775_v46 = vld [vmem:[#allocation2] sm:$0xff]  ;;  %v1561_v53 = vld [vmem:[%s3214_s6 + $0x48] sm:$0xff] }
 0x13a   : > { %2101 = vmatprep.subr.bf16.mxu1 %v2214_v14  ;;  %2078 = vmatprep.subr.bf16.mxu0 %v2214_v14  ;;  %791 = vst.msk [vmem:[#allocation3] sm:$0xff] %vm716_vm3, %v775_v46  ;;  %v2747_v48 = vld [vmem:[#allocation2 + $0x7a] sm:$0xff]  ;;  %v2082_v51 = vpack.c.bf16 %v1559_v45, %v1558_v44  ;;  %v904_v54 = vld [vmem:[#allocation2 + $0x2] sm:$0xff]  ;;  %v1562_v56 = vld [vmem:[%s3214_s6 + $0x50] sm:$0xff] }
 0x13b   : > { %2006 = vmatprep.mubr.msk.f32.mxu1 %vm716_vm3, %v1535_v47  ;;  %v1560_v52 = vld [vmem:[%s3214_s6 + $0x40] sm:$0xff]  ;;  %v1563_v59 = vld [vmem:[%s3214_s6 + $0x58] sm:$0xff]  ;;  %v776_v60 = vld [vmem:[#allocation2 + $0x8] sm:$0xff] }
 0x13c   : > { %2110 = vmatpush1.bf16.msra.mxu1 %v2079_v40  ;;  %2080 = vmatpush1.bf16.msra.mxu0 %v2079_v40  ;;  %v2085_v55 = vpack.c.bf16 %v1561_v53, %v1560_v52  ;;  %v2088_v61 = vpack.c.bf16 %v1563_v59, %v1562_v56  ;;  %792 = vst.msk [vmem:[#allocation3 + $0x10] sm:$0xff] %vm716_vm3, %v776_v60  ;;  %v1564_v62 = vld [vmem:[%s3214_s6 + $0x60] sm:$0xff]  ;;  %v1565_v63 = vld [vmem:[%s3214_s6 + $0x68] sm:$0xff]  ;;  %v2790_v4 = vld [vmem:[#allocation2 + $0x91] sm:$0xff] }
 0x13d   : > { %1147 = vrot.lane.b32.xlu0 %v2725_v37, %s2216_s9  ;;  %839 = vrot.lane.b32.xlu1 %v807_v38, %s2212_s24  ;;  %v2781_v0 = vld [vmem:[#allocation2 + $0x4a] sm:$0xff]  ;;  %v2091_v6 = vpack.c.bf16 %v1565_v63, %v1564_v62  ;;  %v2792_v7 = vld [vmem:[#allocation2 + $0xb2] sm:$0xff]  ;;  %v1568_v2 = vld [vmem:[%s3214_s6 + $0x80] sm:$0xff] }
 0x13e   : > { %2102 = vmatprep.subr.bf16.mxu1 %v2214_v14  ;;  %2081 = vmatprep.subr.bf16.mxu0 %v2214_v14  ;;  %1506 = vst.msk [vmem:[#allocation3 + $0x28] sm:$0xff] %vm716_vm3, %v2781_v0  ;;  %v1566_v8 = vld [vmem:[%s3214_s6 + $0x70] sm:$0xff]  ;;  %v1567_v12 = vld [vmem:[%s3214_s6 + $0x78] sm:$0xff]  ;;  %1515 = vst.msk [vmem:[#allocation3 + $0xb8] sm:$0xff] %vm716_vm3, %v2792_v7 }
 0x13f   : > { %v1099_v13 = vld [vmem:[#allocation2 + $0x19] sm:$0xff]  ;;  %v2094_v15 = vpack.c.bf16 %v1567_v12, %v1566_v8  ;;  %v905_v20 = vld [vmem:[#allocation2 + $0xa] sm:$0xff]  ;;  %v2843_v24 = vld [vmem:[#allocation2 + $0xc2] sm:$0xff] }
 0x140   : > { %2111 = vmatpush1.bf16.msra.mxu1 %v2082_v51  ;;  %2083 = vmatpush1.bf16.msra.mxu0 %v2082_v51  ;;  %v1196_v19 = vld [vmem:[#allocation2 + $0x1a] sm:$0xff]  ;;  %v2839_v22 = vld [vmem:[#allocation2 + $0x31] sm:$0xff]  ;;  %1516 = vst.msk [vmem:[#allocation3 + $0xc8] sm:$0xff] %vm716_vm3, %v2843_v24  ;;  %v2906_v32 = vld [vmem:[#allocation2 + $0x49] sm:$0xff] }
 0x141   : > { %857 = vrot.lane.b32.xlu0 %v2609_v9, %s2212_s24  ;;  %1244 = vrot.lane.b32.xlu1 %v2747_v48, %s2217_s25  ;;  %v2841_v23 = vld [vmem:[#allocation2 + $0x99] sm:$0xff]  ;;  %v1100_v31 = vld [vmem:[#allocation2 + $0x21] sm:$0xff] }
 0x142   : > { %2103 = vmatprep.subr.bf16.mxu1 %v2214_v14  ;;  %2084 = vmatprep.subr.bf16.mxu0 %v2214_v14  ;;  %v1491_v47 = vld [vmem:[#allocation2 + $0x52] sm:$0xff]  ;;  %v2942_v52 = vld [vmem:[#allocation2 + $0xc0] sm:$0xff]  ;;  %v1539_v12 = vld [vmem:[#allocation3 + $0x98] sm:$0xff] }
 0x143   : > { %1507 = vst.msk [vmem:[#allocation3 + $0x38] sm:$0xff] %vm716_vm3, %v1491_v47  ;;  %v1537_v56 = vld [vmem:[#allocation3 + $0x88] sm:$0xff]  ;;  %v1403_v59 = vld [vmem:[#allocation2 + $0xc1] sm:$0xff] }
 0x144   : > { %2112 = vmatpush1.bf16.msra.mxu1 %v2085_v55  ;;  %2086 = vmatpush1.bf16.msra.mxu0 %v2085_v55 }
 0x145   : > { %936 = vrot.lane.b32.xlu0 %v904_v54, %s2215_s8  ;;  %954 = vrot.lane.b32.xlu1 %v2633_v34, %s2215_s8 }
 0x146   : > { %2104 = vmatprep.subr.bf16.mxu1 %v2214_v14  ;;  %2087 = vmatprep.subr.bf16.mxu0 %v2214_v14 }
 0x148   : > { %2113 = vmatpush1.bf16.msra.mxu1 %v2088_v61  ;;  %2089 = vmatpush1.bf16.msra.mxu0 %v2088_v61 }
 0x149   : > { %1342 = vrot.lane.b32.xlu0 %v2621_v25, %s2218_s10  ;;  %1034 = vrot.lane.b32.xlu1 %v2627_v26, %s2213_s22  ;;  %v1569_v26 = vld [vmem:[%s3214_s6 + $0x88] sm:$0xff] }
 0x14a   : > { %2105 = vmatprep.subr.bf16.mxu1 %v2214_v14  ;;  %2090 = vmatprep.subr.bf16.mxu0 %v2214_v14  ;;  %v2097_v34 = vpack.c.bf16 %v1569_v26, %v1568_v2  ;;  %v2988_v26 = vld [vmem:[#allocation2 + $0xc8] sm:$0xff] }
 0x14c   : > { %2114 = vmatpush1.bf16.msra.mxu1 %v2091_v6  ;;  %2092 = vmatpush1.bf16.msra.mxu0 %v2091_v6 }
 0x14d   : > { %1052 = vrot.lane.b32.xlu0 %v2611_v10, %s2213_s22  ;;  %1439 = vrot.lane.b32.xlu1 %v2790_v4, %s2219_s13  ;;  %v808_v10 = vld [vmem:[#allocation2 + $0x9] sm:$0xff] }
 0x14e   : > { %2106 = vmatprep.subr.bf16.mxu1 %v2214_v14  ;;  %2093 = vmatprep.subr.bf16.mxu0 %v2214_v14 }
 0x150   : > { %2115 = vmatpush1.bf16.msra.mxu1 %v2094_v15  ;;  %2095 = vmatpush1.bf16.msra.mxu0 %v2094_v15 }
 0x151   : > { %1131 = vrot.lane.b32.xlu0 %v1099_v13, %s2216_s9  ;;  %1149 = vrot.lane.b32.xlu1 %v2699_v28, %s2216_s9 }
 0x152   : > { %2107 = vmatprep.subr.bf16.mxu1 %v2214_v14  ;;  %2096 = vmatprep.subr.bf16.mxu0 %v2214_v14  ;;  %v1521_v14 = vld [vmem:[#allocation3 + $0x8] sm:$0xff] }
 0x153   : > { %1999 = vmatprep.mubr.msk.f32.mxu0 %vm716_vm3, %v1521_v14 }
 0x154   : > { %2116 = vmatpush1.bf16.msra.mxu1 %v2097_v34  ;;  %2098 = vmatpush1.bf16.msra.mxu0 %v2097_v34 }
 0x155   : > { %841 = vrot.lane.b32.xlu0 %v808_v10, %s2212_s24  ;;  %859 = vrot.lane.b32.xlu1 %v2725_v37, %s2212_s24 }
 0x159   : > { %1228 = vrot.lane.b32.xlu0 %v1196_v19, %s2217_s25  ;;  %1246 = vrot.lane.b32.xlu1 %v2635_v41, %s2217_s25 }
 0x15d   : > { %938 = vrot.lane.b32.xlu0 %v905_v20, %s2215_s8  ;;  %956 = vrot.lane.b32.xlu1 %v2747_v48, %s2215_s8 }
 0x161   : > { %1326 = vrot.lane.b32.xlu0 %v2639_v42, %s2218_s10  ;;  %1344 = vrot.lane.b32.xlu1 %v2641_v49, %s2218_s10 }
 0x165   : > { %1036 = vrot.lane.b32.xlu0 %v2645_v50, %s2213_s22  ;;  %1054 = vrot.lane.b32.xlu1 %v2621_v25, %s2213_s22  ;;  %v1197_v25 = vld [vmem:[#allocation2 + $0x22] sm:$0xff]  ;;  %v2867_v50 = vld [vmem:[#allocation2 + $0xca] sm:$0xff] }
 0x166   : > { %1517 = vst.msk [vmem:[#allocation3 + $0xd8] sm:$0xff] %vm716_vm3, %v2867_v50 }
 0x169   : > { %1423 = vrot.lane.b32.xlu0 %v2839_v22, %s2219_s13  ;;  %1441 = vrot.lane.b32.xlu1 %v2841_v23, %s2219_s13 }
 0x16d   : > { %1133 = vrot.lane.b32.xlu0 %v1100_v31, %s2216_s9  ;;  %1151 = vrot.lane.b32.xlu1 %v2790_v4, %s2216_s9 }
 0x171   : > { %843 = vrot.lane.b32.xlu0 %v1099_v13, %s2212_s24  ;;  %861 = vrot.lane.b32.xlu1 %v2699_v28, %s2212_s24  ;;  %v2875_v28 = vld [vmem:[#allocation2 + $0x39] sm:$0xff]  ;;  %v1492_v13 = vld [vmem:[#allocation2 + $0x62] sm:$0xff] }
 0x172   : > { %1508 = vst.msk [vmem:[#allocation3 + $0x48] sm:$0xff] %vm716_vm3, %v1492_v13 }
 0x175   : > { %1230 = vrot.lane.b32.xlu0 %v1197_v25, %s2217_s25  ;;  %1248 = vrot.lane.b32.xlu1 %v2655_v57, %s2217_s25 }
 0x179   : > { %940 = vrot.lane.b32.xlu0 %v1196_v19, %s2215_s8  ;;  %958 = vrot.lane.b32.xlu1 %v2635_v41, %s2215_s8  ;;  %v2877_v41 = vld [vmem:[#allocation2 + $0xa9] sm:$0xff] }
 0x17d   : > { %1328 = vrot.lane.b32.xlu0 %v2661_v3, %s2218_s10  ;;  %1346 = vrot.lane.b32.xlu1 %v2663_v17, %s2218_s10 }
 0x181   : > { %1038 = vrot.lane.b32.xlu0 %v2639_v42, %s2213_s22  ;;  %1056 = vrot.lane.b32.xlu1 %v2641_v49, %s2213_s22 }
 0x185   : > { %1425 = vrot.lane.b32.xlu0 %v2875_v28, %s2219_s13  ;;  %1443 = vrot.lane.b32.xlu1 %v2877_v41, %s2219_s13 }
 0x189   : > { %1135 = vrot.lane.b32.xlu0 %v2839_v22, %s2216_s9  ;;  %1153 = vrot.lane.b32.xlu1 %v2841_v23, %s2216_s9 }
 0x18d   : > { %845 = vrot.lane.b32.xlu0 %v1100_v31, %s2212_s24  ;;  %863 = vrot.lane.b32.xlu1 %v2790_v4, %s2212_s24 }
 0x191   : > { %1232 = vrot.lane.b32.xlu0 %v2667_v18, %s2217_s25  ;;  %1250 = vrot.lane.b32.xlu1 %v2679_v21, %s2217_s25 }
 0x195   : > { %942 = vrot.lane.b32.xlu0 %v1197_v25, %s2215_s8  ;;  %960 = vrot.lane.b32.xlu1 %v2655_v57, %s2215_s8  ;;  %v2908_v57 = vld [vmem:[#allocation2 + $0xb1] sm:$0xff]  ;;  %v1523_v25 = vld [vmem:[#allocation3 + $0x18] sm:$0xff] }
 0x199   : > { %1330 = vrot.lane.b32.xlu0 %v2693_v27, %s2218_s10  ;;  %1348 = vrot.lane.b32.xlu1 %v2703_v30, %s2218_s10 }
 0x19a   : > { %v854_v42 = vpop.permute.xlu0 %853  ;;  %v1049_v49 = vpop.permute.xlu1 %1048 }
 0x19b   : > { %895 = vst.msk [vmem:[#allocation3 + $0x70] sm:$0xff] %vm887_vm6, %v854_v42 }
 0x19d   : > { %1040 = vrot.lane.b32.xlu0 %v2661_v3, %s2213_s22  ;;  %1058 = vrot.lane.b32.xlu1 %v2663_v17, %s2213_s22 }
 0x19f   : > { %v951_v35 = vpop.permute.xlu0 %950  ;;  %v1146_v38 = vpop.permute.xlu1 %1145 }
 0x1a0   : > { %992 = vst.msk [vmem:[#allocation3 + $0x70] sm:$0xff] %vm984_vm7, %v951_v35 }
 0x1a1   : > { %1427 = vrot.lane.b32.xlu0 %v2906_v32, %s2219_s13  ;;  %1090 = vst.msk [vmem:[#allocation3 + $0x70] sm:$0xff] %vm1082_vm8, %v1049_v49  ;;  %1445 = vrot.lane.b32.xlu1 %v2908_v57, %s2219_s13 }
 0x1a2   : > { %1187 = vst.msk [vmem:[#allocation3 + $0x70] sm:$0xff] %vm1179_vm9, %v1146_v38 }
 0x1a3   : > { %v856_v3 = vpop.permute.xlu0 %855  ;;  %v1243_v17 = vpop.permute.xlu1 %1242 }
 0x1a4   : > { %896 = vst.msk [vmem:[#allocation3 + $0x80] sm:$0xff] %vm887_vm6, %v856_v3 }
 0x1a5   : > { %1284 = vst.msk [vmem:[#allocation3 + $0x70] sm:$0xff] %vm1276_vm10, %v1243_v17  ;;  %1137 = vrot.lane.b32.xlu0 %v2875_v28, %s2216_s9  ;;  %1155 = vrot.lane.b32.xlu1 %v2877_v41, %s2216_s9 }
 0x1a7   : > { %v953_v40 = vpop.permute.xlu0 %952  ;;  %v1341_v44 = vpop.permute.xlu1 %1340 }
 0x1a8   : > { %993 = vst.msk [vmem:[#allocation3 + $0x80] sm:$0xff] %vm984_vm7, %v953_v40 }
 0x1a9   : > { %1382 = vst.msk [vmem:[#allocation3 + $0x70] sm:$0xff] %vm1374_vm11, %v1341_v44  ;;  %847 = vrot.lane.b32.xlu0 %v2839_v22, %s2212_s24  ;;  %865 = vrot.lane.b32.xlu1 %v2841_v23, %s2212_s24 }
 0x1ab   : > { %v1051_v45 = vpop.permute.xlu0 %1050  ;;  %v1438_v46 = vpop.permute.xlu1 %1437 }
 0x1ac   : > { %1091 = vst.msk [vmem:[#allocation3 + $0x80] sm:$0xff] %vm1082_vm8, %v1051_v45 }
 0x1ad   : > { %1479 = vst.msk [vmem:[#allocation3 + $0x70] sm:$0xff] %vm1471_vm12, %v1438_v46  ;;  %1234 = vrot.lane.b32.xlu0 %v2727_v39, %s2217_s25  ;;  %1252 = vrot.lane.b32.xlu1 %v2729_v43, %s2217_s25 }
 0x1af   : > { %v1148_v48 = vpop.permute.xlu0 %1147  ;;  %v840_v51 = vpop.permute.xlu1 %839 }
 0x1b0   : > { %1188 = vst.msk [vmem:[#allocation3 + $0x80] sm:$0xff] %vm1179_vm9, %v1148_v48  ;;  %v1309_v48 = vld [vmem:[#allocation2 + $0xe0] sm:$0xff] }
 0x1b1   : > { %888 = vst.msk [vmem:[#allocation3] sm:$0xff] %vm887_vm6, %v840_v51  ;;  %944 = vrot.lane.b32.xlu0 %v2667_v18, %s2215_s8  ;;  %962 = vrot.lane.b32.xlu1 %v2679_v21, %s2215_s8 }
 0x1b3   : > { %v858_v53 = vpop.permute.xlu0 %857  ;;  %v1245_v54 = vpop.permute.xlu1 %1244 }
 0x1b4   : > { %v1534_v55 = vld [vmem:[#allocation3 + $0x70] sm:$0xff]  ;;  %897 = vst.msk [vmem:[#allocation3 + $0x90] sm:$0xff] %vm887_vm6, %v858_v53 }
 0x1b5   : > { %1285 = vst.msk [vmem:[#allocation3 + $0x80] sm:$0xff] %vm1276_vm10, %v1245_v54  ;;  %1718 = vmatmul.mubr.f32.vlgmr.msra.gmra.mrb[0].mxu1 %v1534_v55  ;;  %1332 = vrot.lane.b32.xlu0 %v2695_v1, %s2218_s10  ;;  %v1543_v55 = vld [vmem:[#allocation3 + $0xb8] sm:$0xff] }
 0x1b6   : > { %1350 = vrot.lane.b32.xlu1 %v2942_v52, %s2218_s10  ;;  %2007 = vmatprep.mubr.msk.f32.mxu1 %vm716_vm3, %v1537_v56 }
 0x1b7   : > { %v937_v18 = vpop.permute.xlu0 %936  ;;  %v955_v21 = vpop.permute.xlu1 %954 }
 0x1b8   : > { %985 = vst.msk [vmem:[#allocation3] sm:$0xff] %vm984_vm7, %v937_v18  ;;  %994 = vst.msk [vmem:[#allocation3 + $0x90] sm:$0xff] %vm984_vm7, %v955_v21 }
 0x1b9   : > { %1042 = vrot.lane.b32.xlu0 %v2693_v27, %s2213_s22 }
 0x1ba   : > { %1060 = vrot.lane.b32.xlu1 %v2703_v30, %s2213_s22 }
 0x1bb   : > { %v1343_v60 = vpop.permute.xlu0 %1342  ;;  %v1035_v61 = vpop.permute.xlu1 %1034 }
 0x1bc   : > { %1383 = vst.msk [vmem:[#allocation3 + $0x80] sm:$0xff] %vm1374_vm11, %v1343_v60 }
 0x1bd   : > { %1083 = vst.msk [vmem:[#allocation3] sm:$0xff] %vm1082_vm8, %v1035_v61  ;;  %1429 = vrot.lane.b32.xlu0 %v2549_v29, %s2219_s13 }
 0x1be   : > { %1447 = vrot.lane.b32.xlu1 %v1403_v59, %s2219_s13 }
 0x1bf   : > { %v1053_v62 = vpop.permute.xlu0 %1052  ;;  %v1440_v63 = vpop.permute.xlu1 %1439 }
 0x1c0   : > { %1092 = vst.msk [vmem:[#allocation3 + $0x90] sm:$0xff] %vm1082_vm8, %v1053_v62 }
 0x1c1   : > { %1480 = vst.msk [vmem:[#allocation3 + $0x80] sm:$0xff] %vm1471_vm12, %v1440_v63  ;;  %1139 = vrot.lane.b32.xlu0 %v2906_v32, %s2216_s9 }
 0x1c2   : > { %1157 = vrot.lane.b32.xlu1 %v2908_v57, %s2216_s9 }
 0x1c3   : > { %v1132_v27 = vpop.permute.xlu0 %1131  ;;  %v1150_v30 = vpop.permute.xlu1 %1149 }
 0x1c4   : > { %1180 = vst.msk [vmem:[#allocation3] sm:$0xff] %vm1179_vm9, %v1132_v27  ;;  %1189 = vst.msk [vmem:[#allocation3 + $0x90] sm:$0xff] %vm1179_vm9, %v1150_v30  ;;  %v1527_v30 = vld [vmem:[#allocation3 + $0x38] sm:$0xff] }
 0x1c5   : > { %849 = vrot.lane.b32.xlu0 %v2875_v28, %s2212_s24 }
 0x1c6   : > { %867 = vrot.lane.b32.xlu1 %v2877_v41, %s2212_s24 }
 0x1c7   : > { %v842_v4 = vpop.permute.xlu0 %841  ;;  %v860_v6 = vpop.permute.xlu1 %859 }
 0x1c8   : > { %v1536_v8 = vld [vmem:[#allocation3 + $0x80] sm:$0xff]  ;;  %889 = vst.msk [vmem:[#allocation3 + $0x10] sm:$0xff] %vm887_vm6, %v842_v4  ;;  %898 = vst.msk [vmem:[#allocation3 + $0xa0] sm:$0xff] %vm887_vm6, %v860_v6  ;;  %v1545_v4 = vld [vmem:[#allocation3 + $0xc8] sm:$0xff] }
 0x1c9   : > { %1723 = vmatmul.mubr.f32.gmra.mrb[2].mxu1 %v1536_v8  ;;  %1236 = vrot.lane.b32.xlu0 %v2781_v0, %s2217_s25 }
 0x1ca   : > { %1254 = vrot.lane.b32.xlu1 %v2792_v7, %s2217_s25  ;;  %2008 = vmatprep.mubr.msk.f32.mxu1 %vm716_vm3, %v1539_v12 }
 0x1cb   : > { %v1229_v15 = vpop.permute.xlu0 %1228  ;;  %v1247_v2 = vpop.permute.xlu1 %1246 }
 0x1cc   : > { %1277 = vst.msk [vmem:[#allocation3] sm:$0xff] %vm1276_vm10, %v1229_v15  ;;  %1286 = vst.msk [vmem:[#allocation3 + $0x90] sm:$0xff] %vm1276_vm10, %v1247_v2 }
 0x1cd   : > { %946 = vrot.lane.b32.xlu0 %v2727_v39, %s2215_s8  ;;  %v3002_v39 = vld [vmem:[#allocation2 + $0xc9] sm:$0xff] }
 0x1ce   : > { %964 = vrot.lane.b32.xlu1 %v2729_v43, %s2215_s8 }
 0x1cf   : > { %v939_v10 = vpop.permute.xlu0 %938  ;;  %v957_v34 = vpop.permute.xlu1 %956 }
 0x1d0   : > { %986 = vst.msk [vmem:[#allocation3 + $0x10] sm:$0xff] %vm984_vm7, %v939_v10  ;;  %995 = vst.msk [vmem:[#allocation3 + $0xa0] sm:$0xff] %vm984_vm7, %v957_v34 }
 0x1d1   : > { %1334 = vrot.lane.b32.xlu0 %v2716_v36, %s2218_s10 }
 0x1d2   : > { %1352 = vrot.lane.b32.xlu1 %v2988_v26, %s2218_s10 }
 0x1d3   : > { %v1327_v19 = vpop.permute.xlu0 %1326  ;;  %v1345_v20 = vpop.permute.xlu1 %1344 }
 0x1d4   : > { %1375 = vst.msk [vmem:[#allocation3] sm:$0xff] %vm1374_vm11, %v1327_v19  ;;  %1384 = vst.msk [vmem:[#allocation3 + $0x90] sm:$0xff] %vm1374_vm11, %v1345_v20 }
 0x1d5   : > { %1044 = vrot.lane.b32.xlu0 %v2695_v1, %s2213_s22 }
 0x1d6   : > { %1062 = vrot.lane.b32.xlu1 %v2942_v52, %s2213_s22 }
 0x1d7   : > { %v1037_v43 = vpop.permute.xlu0 %1036  ;;  %v1055_v14 = vpop.permute.xlu1 %1054 }
 0x1d8   : > { %1084 = vst.msk [vmem:[#allocation3 + $0x10] sm:$0xff] %vm1082_vm8, %v1037_v43  ;;  %1093 = vst.msk [vmem:[#allocation3 + $0xa0] sm:$0xff] %vm1082_vm8, %v1055_v14 }
 0x1d9   : > { %1431 = vrot.lane.b32.xlu0 %v2631_v33, %s2219_s13 }
 0x1da   : > { %1449 = vrot.lane.b32.xlu1 %v3002_v39, %s2219_s13 }
 0x1db   : > { %v1424_v22 = vpop.permute.xlu0 %1423  ;;  %v1442_v23 = vpop.permute.xlu1 %1441 }
 0x1dc   : > { %1472 = vst.msk [vmem:[#allocation3] sm:$0xff] %vm1471_vm12, %v1424_v22  ;;  %1481 = vst.msk [vmem:[#allocation3 + $0x90] sm:$0xff] %vm1471_vm12, %v1442_v23 }
 0x1dd   : > { %1141 = vrot.lane.b32.xlu0 %v2549_v29, %s2216_s9  ;;  %v1541_v29 = vld [vmem:[#allocation3 + $0xa8] sm:$0xff] }
 0x1de   : > { %1159 = vrot.lane.b32.xlu1 %v1403_v59, %s2216_s9 }
 0x1df   : > { %v1134_v1 = vpop.permute.xlu0 %1133  ;;  %v1152_v31 = vpop.permute.xlu1 %1151 }
 0x1e0   : > { %1181 = vst.msk [vmem:[#allocation3 + $0x10] sm:$0xff] %vm1179_vm9, %v1134_v1  ;;  %1190 = vst.msk [vmem:[#allocation3 + $0xa0] sm:$0xff] %vm1179_vm9, %v1152_v31  ;;  %v1529_v1 = vld [vmem:[#allocation3 + $0x48] sm:$0xff]  ;;  %v1547_v31 = vld [vmem:[#allocation3 + $0xd8] sm:$0xff] }
 0x1e1   : > { %851 = vrot.lane.b32.xlu0 %v2906_v32, %s2212_s24  ;;  %v1493_v32 = vld [vmem:[#allocation2 + $0x6a] sm:$0xff] }
 0x1e2   : > { %869 = vrot.lane.b32.xlu1 %v2908_v57, %s2212_s24  ;;  %1509 = vst.msk [vmem:[#allocation3 + $0x58] sm:$0xff] %vm716_vm3, %v1493_v32  ;;  %s2220_s24 = smov 4  }
 0x1e3   : > { %v844_v28 = vpop.permute.xlu0 %843  ;;  %v1520_v41 = vld [vmem:[#allocation3] sm:$0xff]  ;;  %v862_v42 = vpop.permute.xlu1 %861  ;;  %v1538_v49 = vld [vmem:[#allocation3 + $0x90] sm:$0xff] }
 0x1e4   : > { %890 = vst.msk [vmem:[#allocation3 + $0x20] sm:$0xff] %vm887_vm6, %v844_v28  ;;  %1683 = vmatmul.mubr.f32.vlgmr.msra.gmra.mrb[20].mxu0 %v1520_v41  ;;  %899 = vst.msk [vmem:[#allocation3 + $0xb0] sm:$0xff] %vm887_vm6, %v862_v42  ;;  %1728 = vmatmul.mubr.f32.gmra.mrb[4].mxu1 %v1538_v49 }
 0x1e5   : > { %1238 = vrot.lane.b32.xlu0 %v2605_v5, %s2217_s25  ;;  %2000 = vmatprep.mubr.msk.f32.mxu0 %vm716_vm3, %v1523_v25  ;;  %v1502_v5 = vld [vmem:[#allocation2 + $0xda] sm:$0xff] }
 0x1e6   : > { %1256 = vrot.lane.b32.xlu1 %v2843_v24, %s2217_s25  ;;  %2009 = vmatprep.mubr.msk.f32.mxu1 %vm716_vm3, %v1541_v29  ;;  %v1308_v24 = vld [vmem:[#allocation2 + $0xd8] sm:$0xff]  ;;  %1518 = vst.msk [vmem:[#allocation3 + $0xe8] sm:$0xff] %vm716_vm3, %v1502_v5 }
 0x1e7   : > { %v1231_v57 = vpop.permute.xlu0 %1230  ;;  %v1249_v35 = vpop.permute.xlu1 %1248 }
 0x1e8   : > { %1278 = vst.msk [vmem:[#allocation3 + $0x10] sm:$0xff] %vm1276_vm10, %v1231_v57  ;;  %1287 = vst.msk [vmem:[#allocation3 + $0xa0] sm:$0xff] %vm1276_vm10, %v1249_v35 }
 0x1e9   : > { %948 = vrot.lane.b32.xlu0 %v2781_v0, %s2215_s8 }
 0x1ea   : > { %966 = vrot.lane.b32.xlu1 %v2792_v7, %s2215_s8  ;;  %v1405_v7 = vld [vmem:[#allocation2 + $0xd9] sm:$0xff] }
 0x1eb   : > { %v941_v38 = vpop.permute.xlu0 %940  ;;  %v959_v3 = vpop.permute.xlu1 %958 }
 0x1ec   : > { %987 = vst.msk [vmem:[#allocation3 + $0x20] sm:$0xff] %vm984_vm7, %v941_v38  ;;  %996 = vst.msk [vmem:[#allocation3 + $0xb0] sm:$0xff] %vm984_vm7, %v959_v3 }
 0x1ed   : > { %1336 = vrot.lane.b32.xlu0 %v2551_v16, %s2218_s10  ;;  %v1494_v16 = vld [vmem:[#allocation2 + $0x7a] sm:$0xff] }
 0x1ee   : > { %1354 = vrot.lane.b32.xlu1 %v1308_v24, %s2218_s10  ;;  %1510 = vst.msk [vmem:[#allocation3 + $0x68] sm:$0xff] %vm716_vm3, %v1494_v16 }
 0x1ef   : > { %v1329_v17 = vpop.permute.xlu0 %1328  ;;  %v1347_v0 = vpop.permute.xlu1 %1346 }
 0x1f0   : > { %1376 = vst.msk [vmem:[#allocation3 + $0x10] sm:$0xff] %vm1374_vm11, %v1329_v17  ;;  %1385 = vst.msk [vmem:[#allocation3 + $0xa0] sm:$0xff] %vm1374_vm11, %v1347_v0 }
 0x1f1   : > { %1046 = vrot.lane.b32.xlu0 %v2716_v36, %s2213_s22  ;;  %v1503_v36 = vld [vmem:[#allocation2 + $0xe2] sm:$0xff] }
 0x1f2   : > { %1064 = vrot.lane.b32.xlu1 %v2988_v26, %s2213_s22  ;;  %1519 = vst.msk [vmem:[#allocation3 + $0xf8] sm:$0xff] %vm716_vm3, %v1503_v36 }
 0x1f3   : > { %v1039_v40 = vpop.permute.xlu0 %1038  ;;  %v1057_v44 = vpop.permute.xlu1 %1056 }
 0x1f4   : > { %1085 = vst.msk [vmem:[#allocation3 + $0x20] sm:$0xff] %vm1082_vm8, %v1039_v40  ;;  %1094 = vst.msk [vmem:[#allocation3 + $0xb0] sm:$0xff] %vm1082_vm8, %v1057_v44  ;;  %v1531_v40 = vld [vmem:[#allocation3 + $0x58] sm:$0xff]  ;;  %v1549_v44 = vld [vmem:[#allocation3 + $0xe8] sm:$0xff] }
 0x1f5   : > { %1433 = vrot.lane.b32.xlu0 %v2609_v9, %s2219_s13 }
 0x1f6   : > { %1451 = vrot.lane.b32.xlu1 %v1405_v7, %s2219_s13 }
 0x1f7   : > { %v1426_v45 = vpop.permute.xlu0 %1425  ;;  %v1444_v46 = vpop.permute.xlu1 %1443 }
 0x1f8   : > { %1473 = vst.msk [vmem:[#allocation3 + $0x10] sm:$0xff] %vm1471_vm12, %v1426_v45  ;;  %1482 = vst.msk [vmem:[#allocation3 + $0xa0] sm:$0xff] %vm1471_vm12, %v1444_v46 }
 0x1f9   : > { %1143 = vrot.lane.b32.xlu0 %v2631_v33, %s2216_s9  ;;  %v1525_v33 = vld [vmem:[#allocation3 + $0x28] sm:$0xff] }
 0x1fa   : > { %1161 = vrot.lane.b32.xlu1 %v3002_v39, %s2216_s9 }
 0x1fb   : > { %v1136_v9 = vpop.permute.xlu0 %1135  ;;  %v1154_v47 = vpop.permute.xlu1 %1153 }
 0x1fc   : > { %1182 = vst.msk [vmem:[#allocation3 + $0x20] sm:$0xff] %vm1179_vm9, %v1136_v9  ;;  %1191 = vst.msk [vmem:[#allocation3 + $0xb0] sm:$0xff] %vm1179_vm9, %v1154_v47 }
 0x1fd   : > { %1240 = vrot.lane.b32.xlu0 %v2659_v58, %s2217_s25  ;;  %v1406_v58 = vld [vmem:[#allocation2 + $0xe1] sm:$0xff] }
 0x1fe   : > { %1258 = vrot.lane.b32.xlu1 %v2867_v50, %s2217_s25 }
 0x1ff   : > { %v846_v51 = vpop.permute.xlu0 %845  ;;  %v1522_v52 = vld [vmem:[#allocation3 + $0x10] sm:$0xff]  ;;  %v864_v53 = vpop.permute.xlu1 %863  ;;  %v1540_v54 = vld [vmem:[#allocation3 + $0xa0] sm:$0xff] }
 0x200   : > { %891 = vst.msk [vmem:[#allocation3 + $0x30] sm:$0xff] %vm887_vm6, %v846_v51  ;;  %1688 = vmatmul.mubr.f32.gmra.mrb[22].mxu0 %v1522_v52  ;;  %900 = vst.msk [vmem:[#allocation3 + $0xc0] sm:$0xff] %vm887_vm6, %v864_v53  ;;  %1733 = vmatmul.mubr.f32.gmra.mrb[6].mxu1 %v1540_v54 }
 0x201   : > { %1338 = vrot.lane.b32.xlu0 %v2613_v11, %s2218_s10  ;;  %2001 = vmatprep.mubr.msk.f32.mxu0 %vm716_vm3, %v1525_v33 }
 0x202   : > { %1356 = vrot.lane.b32.xlu1 %v1309_v48, %s2218_s10  ;;  %2010 = vmatprep.mubr.msk.f32.mxu1 %vm716_vm3, %v1543_v55 }
 0x203   : > { %v1233_v50 = vpop.permute.xlu0 %1232  ;;  %v1251_v56 = vpop.permute.xlu1 %1250 }
 0x204   : > { %1279 = vst.msk [vmem:[#allocation3 + $0x20] sm:$0xff] %vm1276_vm10, %v1233_v50  ;;  %1288 = vst.msk [vmem:[#allocation3 + $0xb0] sm:$0xff] %vm1276_vm10, %v1251_v56 }
 0x205   : > { %1435 = vrot.lane.b32.xlu0 %v2725_v37, %s2219_s13 }
 0x206   : > { %1453 = vrot.lane.b32.xlu1 %v1406_v58, %s2219_s13 }
 0x207   : > { %v943_v18 = vpop.permute.xlu0 %942  ;;  %v961_v11 = vpop.permute.xlu1 %960 }
 0x208   : > { %988 = vst.msk [vmem:[#allocation3 + $0x30] sm:$0xff] %vm984_vm7, %v943_v18  ;;  %997 = vst.msk [vmem:[#allocation3 + $0xc0] sm:$0xff] %vm984_vm7, %v961_v11  ;;  %v1533_v18 = vld [vmem:[#allocation3 + $0x68] sm:$0xff]  ;;  %v1551_v11 = vld [vmem:[#allocation3 + $0xf8] sm:$0xff] }
 0x20b   : > { %v1331_v21 = vpop.permute.xlu0 %1330  ;;  %v1349_v59 = vpop.permute.xlu1 %1348 }
 0x20c   : > { %1377 = vst.msk [vmem:[#allocation3 + $0x20] sm:$0xff] %vm1374_vm11, %v1331_v21  ;;  %1386 = vst.msk [vmem:[#allocation3 + $0xb0] sm:$0xff] %vm1374_vm11, %v1349_v59 }
 0x20f   : > { %v1041_v60 = vpop.permute.xlu0 %1040  ;;  %v1059_v61 = vpop.permute.xlu1 %1058 }
 0x210   : > { %1086 = vst.msk [vmem:[#allocation3 + $0x30] sm:$0xff] %vm1082_vm8, %v1041_v60  ;;  %1095 = vst.msk [vmem:[#allocation3 + $0xc0] sm:$0xff] %vm1082_vm8, %v1059_v61 }
 0x213   : > { %v1428_v37 = vpop.permute.xlu0 %1427  ;;  %v1446_v62 = vpop.permute.xlu1 %1445 }
 0x214   : > { %1474 = vst.msk [vmem:[#allocation3 + $0x20] sm:$0xff] %vm1471_vm12, %v1428_v37  ;;  %1483 = vst.msk [vmem:[#allocation3 + $0xb0] sm:$0xff] %vm1471_vm12, %v1446_v62 }
 0x217   : > { %v1138_v63 = vpop.permute.xlu0 %1137  ;;  %v1156_v27 = vpop.permute.xlu1 %1155 }
 0x218   : > { %1183 = vst.msk [vmem:[#allocation3 + $0x30] sm:$0xff] %vm1179_vm9, %v1138_v63  ;;  %1192 = vst.msk [vmem:[#allocation3 + $0xc0] sm:$0xff] %vm1179_vm9, %v1156_v27 }
 0x21b   : > { %v848_v6 = vpop.permute.xlu0 %847  ;;  %v1524_v8 = vld [vmem:[#allocation3 + $0x20] sm:$0xff]  ;;  %v866_v12 = vpop.permute.xlu1 %865  ;;  %v1542_v13 = vld [vmem:[#allocation3 + $0xb0] sm:$0xff] }
 0x21c   : > { %892 = vst.msk [vmem:[#allocation3 + $0x40] sm:$0xff] %vm887_vm6, %v848_v6  ;;  %1693 = vmatmul.mubr.f32.gmra.mrb[24].mxu0 %v1524_v8  ;;  %901 = vst.msk [vmem:[#allocation3 + $0xd0] sm:$0xff] %vm887_vm6, %v866_v12  ;;  %1738 = vmatmul.mubr.f32.gmra.mrb[8].mxu1 %v1542_v13 }
 0x21d   : > { %2002 = vmatprep.mubr.msk.f32.mxu0 %vm716_vm3, %v1527_v30  ;;  %2011 = vmatprep.mubr.msk.f32.mxu1 %vm716_vm3, %v1545_v4 }
 0x21f   : > { %v1235_v15 = vpop.permute.xlu0 %1234  ;;  %v1253_v2 = vpop.permute.xlu1 %1252 }
 0x220   : > { %1280 = vst.msk [vmem:[#allocation3 + $0x30] sm:$0xff] %vm1276_vm10, %v1235_v15  ;;  %1289 = vst.msk [vmem:[#allocation3 + $0xc0] sm:$0xff] %vm1276_vm10, %v1253_v2 }
 0x223   : > { %v945_v26 = vpop.permute.xlu0 %944  ;;  %v963_v10 = vpop.permute.xlu1 %962 }
 0x224   : > { %989 = vst.msk [vmem:[#allocation3 + $0x40] sm:$0xff] %vm984_vm7, %v945_v26  ;;  %998 = vst.msk [vmem:[#allocation3 + $0xd0] sm:$0xff] %vm984_vm7, %v963_v10 }
 0x227   : > { %v1333_v34 = vpop.permute.xlu0 %1332 }
 0x228   : > { %v1351_v19 = vpop.permute.xlu1 %1350  ;;  %1378 = vst.msk [vmem:[#allocation3 + $0x30] sm:$0xff] %vm1374_vm11, %v1333_v34 }
 0x229   : > { %1387 = vst.msk [vmem:[#allocation3 + $0xc0] sm:$0xff] %vm1374_vm11, %v1351_v19 }
 0x22b   : > { %v1043_v20 = vpop.permute.xlu0 %1042 }
 0x22c   : > { %v1061_v39 = vpop.permute.xlu1 %1060  ;;  %1087 = vst.msk [vmem:[#allocation3 + $0x40] sm:$0xff] %vm1082_vm8, %v1043_v20 }
 0x22d   : > { %1096 = vst.msk [vmem:[#allocation3 + $0xd0] sm:$0xff] %vm1082_vm8, %v1061_v39 }
 0x22f   : > { %v1430_v43 = vpop.permute.xlu0 %1429 }
 0x230   : > { %v1448_v14 = vpop.permute.xlu1 %1447  ;;  %1475 = vst.msk [vmem:[#allocation3 + $0x30] sm:$0xff] %vm1471_vm12, %v1430_v43 }
 0x231   : > { %1484 = vst.msk [vmem:[#allocation3 + $0xc0] sm:$0xff] %vm1471_vm12, %v1448_v14 }
 0x233   : > { %v1140_v22 = vpop.permute.xlu0 %1139 }
 0x234   : > { %v1158_v23 = vpop.permute.xlu1 %1157  ;;  %1184 = vst.msk [vmem:[#allocation3 + $0x40] sm:$0xff] %vm1179_vm9, %v1140_v22 }
 0x235   : > { %1193 = vst.msk [vmem:[#allocation3 + $0xd0] sm:$0xff] %vm1179_vm9, %v1158_v23 }
 0x237   : > { %v850_v25 = vpop.permute.xlu0 %849  ;;  %v1526_v28 = vld [vmem:[#allocation3 + $0x30] sm:$0xff] }
 0x238   : > { %v868_v41 = vpop.permute.xlu1 %867  ;;  %v1544_v42 = vld [vmem:[#allocation3 + $0xc0] sm:$0xff]  ;;  %893 = vst.msk [vmem:[#allocation3 + $0x50] sm:$0xff] %vm887_vm6, %v850_v25  ;;  %1698 = vmatmul.mubr.f32.gmra.mrb[26].mxu0 %v1526_v28 }
 0x239   : > { %902 = vst.msk [vmem:[#allocation3 + $0xe0] sm:$0xff] %vm887_vm6, %v868_v41  ;;  %1743 = vmatmul.mubr.f32.gmra.mrb[10].mxu1 %v1544_v42  ;;  %2003 = vmatprep.mubr.msk.f32.mxu0 %vm716_vm3, %v1529_v1 }
 0x23a   : > { %2012 = vmatprep.mubr.msk.f32.mxu1 %vm716_vm3, %v1547_v31 }
 0x23b   : > { %v1237_v49 = vpop.permute.xlu0 %1236 }
 0x23c   : > { %v1255_v29 = vpop.permute.xlu1 %1254  ;;  %1281 = vst.msk [vmem:[#allocation3 + $0x40] sm:$0xff] %vm1276_vm10, %v1237_v49 }
 0x23d   : > { %1290 = vst.msk [vmem:[#allocation3 + $0xd0] sm:$0xff] %vm1276_vm10, %v1255_v29 }
 0x23f   : > { %v947_v32 = vpop.permute.xlu0 %946 }
 0x240   : > { %v965_v57 = vpop.permute.xlu1 %964  ;;  %990 = vst.msk [vmem:[#allocation3 + $0x50] sm:$0xff] %vm984_vm7, %v947_v32 }
 0x241   : > { %999 = vst.msk [vmem:[#allocation3 + $0xe0] sm:$0xff] %vm984_vm7, %v965_v57 }
 0x243   : > { %v1335_v35 = vpop.permute.xlu0 %1334 }
 0x244   : > { %v1353_v5 = vpop.permute.xlu1 %1352  ;;  %1379 = vst.msk [vmem:[#allocation3 + $0x40] sm:$0xff] %vm1374_vm11, %v1335_v35 }
 0x245   : > { %1388 = vst.msk [vmem:[#allocation3 + $0xd0] sm:$0xff] %vm1374_vm11, %v1353_v5 }
 0x247   : > { %v1045_v24 = vpop.permute.xlu0 %1044 }
 0x248   : > { %v1063_v38 = vpop.permute.xlu1 %1062  ;;  %1088 = vst.msk [vmem:[#allocation3 + $0x50] sm:$0xff] %vm1082_vm8, %v1045_v24 }
 0x249   : > { %1097 = vst.msk [vmem:[#allocation3 + $0xe0] sm:$0xff] %vm1082_vm8, %v1063_v38 }
 0x24b   : > { %v1432_v3 = vpop.permute.xlu0 %1431 }
 0x24c   : > { %v1450_v17 = vpop.permute.xlu1 %1449  ;;  %1476 = vst.msk [vmem:[#allocation3 + $0x40] sm:$0xff] %vm1471_vm12, %v1432_v3 }
 0x24d   : > { %1485 = vst.msk [vmem:[#allocation3 + $0xd0] sm:$0xff] %vm1471_vm12, %v1450_v17 }
 0x24f   : > { %v1142_v0 = vpop.permute.xlu0 %1141 }
 0x250   : > { %v1160_v7 = vpop.permute.xlu1 %1159  ;;  %1185 = vst.msk [vmem:[#allocation3 + $0x50] sm:$0xff] %vm1179_vm9, %v1142_v0 }
 0x251   : > { %1194 = vst.msk [vmem:[#allocation3 + $0xe0] sm:$0xff] %vm1179_vm9, %v1160_v7 }
 0x253   : > { %v852_v16 = vpop.permute.xlu0 %851  ;;  %v1528_v45 = vld [vmem:[#allocation3 + $0x40] sm:$0xff] }
 0x254   : > { %v870_v46 = vpop.permute.xlu1 %869  ;;  %v1546_v36 = vld [vmem:[#allocation3 + $0xd0] sm:$0xff]  ;;  %894 = vst.msk [vmem:[#allocation3 + $0x60] sm:$0xff] %vm887_vm6, %v852_v16  ;;  %1703 = vmatmul.mubr.f32.gmra.mrb[28].mxu0 %v1528_v45 }
 0x255   : > { %903 = vst.msk [vmem:[#allocation3 + $0xf0] sm:$0xff] %vm887_vm6, %v870_v46  ;;  %1748 = vmatmul.mubr.f32.gmra.mrb[12].mxu1 %v1546_v36  ;;  %2004 = vmatprep.mubr.msk.f32.mxu0 %vm716_vm3, %v1531_v40 }
 0x256   : > { %2013 = vmatprep.mubr.msk.f32.mxu1 %vm716_vm3, %v1549_v44 }
 0x257   : > { %v1239_v9 = vpop.permute.xlu0 %1238 }
 0x258   : > { %v1257_v47 = vpop.permute.xlu1 %1256  ;;  %1282 = vst.msk [vmem:[#allocation3 + $0x50] sm:$0xff] %vm1276_vm10, %v1239_v9 }
 0x259   : > { %1291 = vst.msk [vmem:[#allocation3 + $0xe0] sm:$0xff] %vm1276_vm10, %v1257_v47 }
 0x25b   : > { %v949_v48 = vpop.permute.xlu0 %948 }
 0x25c   : > { %v967_v33 = vpop.permute.xlu1 %966  ;;  %991 = vst.msk [vmem:[#allocation3 + $0x60] sm:$0xff] %vm984_vm7, %v949_v48 }
 0x25d   : > { %1000 = vst.msk [vmem:[#allocation3 + $0xf0] sm:$0xff] %vm984_vm7, %v967_v33 }
 0x25f   : > { %v1337_v51 = vpop.permute.xlu0 %1336 }
 0x260   : > { %v1355_v52 = vpop.permute.xlu1 %1354  ;;  %1380 = vst.msk [vmem:[#allocation3 + $0x50] sm:$0xff] %vm1374_vm11, %v1337_v51 }
 0x261   : > { %1389 = vst.msk [vmem:[#allocation3 + $0xe0] sm:$0xff] %vm1374_vm11, %v1355_v52 }
 0x263   : > { %v1047_v53 = vpop.permute.xlu0 %1046 }
 0x264   : > { %v1065_v54 = vpop.permute.xlu1 %1064  ;;  %1089 = vst.msk [vmem:[#allocation3 + $0x60] sm:$0xff] %vm1082_vm8, %v1047_v53 }
 0x265   : > { %1098 = vst.msk [vmem:[#allocation3 + $0xf0] sm:$0xff] %vm1082_vm8, %v1065_v54 }
 0x267   : > { %v1434_v55 = vpop.permute.xlu0 %1433 }
 0x268   : > { %v1452_v58 = vpop.permute.xlu1 %1451  ;;  %1477 = vst.msk [vmem:[#allocation3 + $0x50] sm:$0xff] %vm1471_vm12, %v1434_v55 }
 0x269   : > { %1486 = vst.msk [vmem:[#allocation3 + $0xe0] sm:$0xff] %vm1471_vm12, %v1452_v58 }
 0x26b   : > { %v1144_v50 = vpop.permute.xlu0 %1143 }
 0x26c   : > { %v1162_v56 = vpop.permute.xlu1 %1161  ;;  %1186 = vst.msk [vmem:[#allocation3 + $0x60] sm:$0xff] %vm1179_vm9, %v1144_v50 }
 0x26d   : > { %1195 = vst.msk [vmem:[#allocation3 + $0xf0] sm:$0xff] %vm1179_vm9, %v1162_v56 }
 0x26f   : > { %v1241_v21 = vpop.permute.xlu0 %1240  ;;  %v1530_v59 = vld [vmem:[#allocation3 + $0x50] sm:$0xff] }
 0x270   : > { %v1259_v60 = vpop.permute.xlu1 %1258  ;;  %v1548_v61 = vld [vmem:[#allocation3 + $0xe0] sm:$0xff]  ;;  %1283 = vst.msk [vmem:[#allocation3 + $0x60] sm:$0xff] %vm1276_vm10, %v1241_v21  ;;  %1708 = vmatmul.mubr.f32.gmra.mrb[30].mxu0 %v1530_v59 }
 0x271   : > { %1292 = vst.msk [vmem:[#allocation3 + $0xf0] sm:$0xff] %vm1276_vm10, %v1259_v60  ;;  %1753 = vmatmul.mubr.f32.gmra.mrb[14].mxu1 %v1548_v61  ;;  %2005 = vmatprep.mubr.msk.f32.mxu0 %vm716_vm3, %v1533_v18 }
 0x272   : > { %2014 = vmatprep.mubr.msk.f32.mxu1 %vm716_vm3, %v1551_v11 }
 0x273   : > { %v1339_v37 = vpop.permute.xlu0 %1338 }
 0x274   : > { %v1357_v62 = vpop.permute.xlu1 %1356  ;;  %1381 = vst.msk [vmem:[#allocation3 + $0x60] sm:$0xff] %vm1374_vm11, %v1339_v37 }
 0x275   : > { %1390 = vst.msk [vmem:[#allocation3 + $0xf0] sm:$0xff] %vm1374_vm11, %v1357_v62 }
 0x277   : > { %v1436_v63 = vpop.permute.xlu0 %1435 }
 0x278   : > { %v1454_v27 = vpop.permute.xlu1 %1453  ;;  %1478 = vst.msk [vmem:[#allocation3 + $0x60] sm:$0xff] %vm1471_vm12, %v1436_v63 }
 0x279   : > { %1487 = vst.msk [vmem:[#allocation3 + $0xf0] sm:$0xff] %vm1471_vm12, %v1454_v27 }
 0x27f   : > { %v1532_v30 = vld [vmem:[#allocation3 + $0x60] sm:$0xff] }
 0x280   : > { %v1550_v4 = vld [vmem:[#allocation3 + $0xf0] sm:$0xff]  ;;  %1713 = vmatmul.mubr.f32.gmra.mrb[32].mxu0 %v1532_v30 }
 0x281   : > { %1758 = vmatmul.mubr.f32.gmra.mrb[16].mxu1 %v1550_v4 }
 0x288   : > { %v1719_v6 = vpop.f32.mrb[0].mxu1 }
 0x289   : > { %v1721_v8 = vpop.f32.mrb[1].mxu1  ;;  %1809 = vrot.lane.b32.xlu1 %v1719_v6, %s2220_s24 }
 0x29c   : > { %v1724_v12 = vpop.f32.mrb[2].mxu1 }
 0x29d   : > { %v1726_v13 = vpop.f32.mrb[3].mxu1 }
 0x2b7   : > { %v1684_v15 = vpop.f32.mrb[20].mxu0  ;;  %v1729_v2 = vpop.f32.mrb[4].mxu1 }
 0x2b8   : > { %1795 = vrot.lane.b32.xlu0 %v1684_v15, %s2220_s24  ;;  %v1686_v26 = vpop.f32.mrb[21].mxu0  ;;  %v1731_v10 = vpop.f32.mrb[5].mxu1 }
 0x2bc   : > { %1811 = vrot.lane.b32.xlu0 %v1724_v12, %s2220_s24 }
 0x2d3   : > { %v1689_v34 = vpop.f32.mrb[22].mxu0  ;;  %v1734_v19 = vpop.f32.mrb[6].mxu1 }
 0x2d4   : > { %1797 = vrot.lane.b32.xlu1 %v1689_v34, %s2220_s24  ;;  %v1691_v20 = vpop.f32.mrb[23].mxu0  ;;  %v1736_v39 = vpop.f32.mrb[7].mxu1 }
 0x2d8   : > { %1813 = vrot.lane.b32.xlu1 %v1729_v2, %s2220_s24 }
 0x2ef   : > { %v1694_v43 = vpop.f32.mrb[24].mxu0  ;;  %v1739_v14 = vpop.f32.mrb[8].mxu1 }
 0x2f0   : > { %1799 = vrot.lane.b32.xlu0 %v1694_v43, %s2220_s24  ;;  %v1696_v22 = vpop.f32.mrb[25].mxu0  ;;  %v1741_v23 = vpop.f32.mrb[9].mxu1 }
 0x2f4   : > { %1815 = vrot.lane.b32.xlu0 %v1734_v19, %s2220_s24 }
 0x2fb   : > { %v1810_v1 = vpop.permute.xlu1 %1809 }
 0x2fc   : > { %1851 = vst.msk [vmem:[%s2310_s23 + $0x38] sm:$0xff] %vm1843_vm13, %v1810_v1 }
 0x30b   : > { %v1699_v31 = vpop.f32.mrb[26].mxu0 }
 0x30c   : > { %v1744_v25 = vpop.f32.mrb[10].mxu1  ;;  %1801 = vrot.lane.b32.xlu1 %v1699_v31, %s2220_s24  ;;  %v1701_v28 = vpop.f32.mrb[27].mxu0 }
 0x30d   : > { %v1746_v41 = vpop.f32.mrb[11].mxu1 }
 0x310   : > { %1817 = vrot.lane.b32.xlu1 %v1739_v14, %s2220_s24 }
 0x327   : > { %v1704_v42 = vpop.f32.mrb[28].mxu0 }
 0x328   : > { %v1749_v49 = vpop.f32.mrb[12].mxu1  ;;  %1803 = vrot.lane.b32.xlu0 %v1704_v42, %s2220_s24  ;;  %v1706_v29 = vpop.f32.mrb[29].mxu0 }
 0x329   : > { %v1751_v32 = vpop.f32.mrb[13].mxu1 }
 0x32a   : > { %v1796_v57 = vpop.permute.xlu0 %1795 }
 0x32b   : > { %1844 = vst.msk [vmem:[%s2310_s23] sm:$0xff] %vm1843_vm13, %v1796_v57 }
 0x32c   : > { %1819 = vrot.lane.b32.xlu0 %v1744_v25, %s2220_s24 }
 0x32e   : > { %v1812_v35 = vpop.permute.xlu0 %1811 }
 0x32f   : > { %1852 = vst.msk [vmem:[%s2310_s23 + $0x40] sm:$0xff] %vm1843_vm13, %v1812_v35 }
 0x343   : > { %v1709_v5 = vpop.f32.mrb[30].mxu0 }
 0x344   : > { %v1754_v24 = vpop.f32.mrb[14].mxu1  ;;  %1805 = vrot.lane.b32.xlu1 %v1709_v5, %s2220_s24  ;;  %v1711_v38 = vpop.f32.mrb[31].mxu0 }
 0x345   : > { %v1756_v3 = vpop.f32.mrb[15].mxu1 }
 0x346   : > { %v1798_v17 = vpop.permute.xlu1 %1797 }
 0x347   : > { %1845 = vst.msk [vmem:[%s2310_s23 + $0x8] sm:$0xff] %vm1843_vm13, %v1798_v17 }
 0x348   : > { %1821 = vrot.lane.b32.xlu1 %v1749_v49, %s2220_s24 }
 0x34a   : > { %v1814_v0 = vpop.permute.xlu1 %1813 }
 0x34b   : > { %1853 = vst.msk [vmem:[%s2310_s23 + $0x48] sm:$0xff] %vm1843_vm13, %v1814_v0 }
 0x353   : > { %v1714_v7 = vpop.f32.mrb[32].mxu0 }
 0x354   : > { %v1759_v40 = vpop.f32.mrb[16].mxu1  ;;  %1807 = vrot.lane.b32.xlu0 %v1714_v7, %s2220_s24  ;;  %v1716_v44 = vpop.f32.mrb[33].mxu0 }
 0x355   : > { %v1761_v16 = vpop.f32.mrb[17].mxu1  ;;  %1825 = vrot.lane.b32.xlu1 %v1759_v40, %s2220_s24 }
 0x358   : > { %1823 = vrot.lane.b32.xlu0 %v1754_v24, %s2220_s24 }
 0x362   : > { %v1800_v45 = vpop.permute.xlu0 %1799 }
 0x363   : > { %1846 = vst.msk [vmem:[%s2310_s23 + $0x10] sm:$0xff] %vm1843_vm13, %v1800_v45 }
 0x366   : > { %v1816_v46 = vpop.permute.xlu0 %1815 }
 0x367   : > { %1854 = vst.msk [vmem:[%s2310_s23 + $0x50] sm:$0xff] %vm1843_vm13, %v1816_v46 }
 0x37e   : > { %v1802_v36 = vpop.permute.xlu1 %1801 }
 0x37f   : > { %1847 = vst.msk [vmem:[%s2310_s23 + $0x18] sm:$0xff] %vm1843_vm13, %v1802_v36 }
 0x382   : > { %v1818_v9 = vpop.permute.xlu1 %1817 }
 0x383   : > { %1855 = vst.msk [vmem:[%s2310_s23 + $0x58] sm:$0xff] %vm1843_vm13, %v1818_v9 }
 0x39a   : > { %v1804_v47 = vpop.permute.xlu0 %1803 }
 0x39b   : > { %1848 = vst.msk [vmem:[%s2310_s23 + $0x20] sm:$0xff] %vm1843_vm13, %v1804_v47 }
 0x39e   : > { %v1820_v48 = vpop.permute.xlu0 %1819 }
 0x39f   : > { %1856 = vst.msk [vmem:[%s2310_s23 + $0x60] sm:$0xff] %vm1843_vm13, %v1820_v48 }
 0x3b6   : > { %v1806_v33 = vpop.permute.xlu1 %1805 }
 0x3b7   : > { %1849 = vst.msk [vmem:[%s2310_s23 + $0x28] sm:$0xff] %vm1843_vm13, %v1806_v33 }
 0x3ba   : > { %v1822_v51 = vpop.permute.xlu1 %1821 }
 0x3bb   : > { %1857 = vst.msk [vmem:[%s2310_s23 + $0x68] sm:$0xff] %vm1843_vm13, %v1822_v51 }
 0x3c6   : > { %v1808_v52 = vpop.permute.xlu0 %1807 }
 0x3c7   : > { %v1826_v53 = vpop.permute.xlu1 %1825  ;;  %1850 = vst.msk [vmem:[%s2310_s23 + $0x30] sm:$0xff] %vm1843_vm13, %v1808_v52 }
 0x3c8   : > { %1859 = vst.msk [vmem:[%s2310_s23 + $0x78] sm:$0xff] %vm1843_vm13, %v1826_v53 }
 0x3ca   : > { %v1824_v54 = vpop.permute.xlu0 %1823 }
 0x3cb   : > { %1858 = vst.msk [vmem:[%s2310_s23 + $0x70] sm:$0xff] %vm1843_vm13, %v1824_v54 }
 0x3cc PF: > { %s17_s28 = sadd.s32 1, %s2207_s28   ;;  %s3216_s24 = smov %s2199_s26 }
 0x3cd   : > { %p14_p11 = scmp.ge.s32.totalorder %s17_s28, 6   ;;  %s3217_s25 = smov %s2203_s27 }
 0x3ce   : > { %s3218_s26 = smov %s3221_s29  ;;  %s3219_s27 = smov %s3225_s30 }
 0x3cf   :  { %16 = sbr.rel (!%p14_p11) target bundleno = 3 (0x3), region = 92 }

</bundles_post_ra>
